<compile_context>
chip_gen: v7x
topology: tpu7x:2x2x1
jax: 0.10.0
libtpu: 0.0.40
codegen_flags: <defaults>
</compile_context>

<pallas_src>
import jax
import jax.numpy as jnp
from jax import lax
from jax.experimental import pallas as pl
from jax.experimental.pallas import tpu as pltpu


def _fused_lstm2_kernel(nsteps_ref,                       # SMEM (1,) int32 (scalar prefetch)
                        lens_ref, x_ref,
                        wih1_ref, whh1_ref, b1_ref,
                        w2_ref, b2_ref,
                        o_ref,
                        gin_sc, h1_sc, c1_sc, h2_sc, c2_sc):
    """Two stacked unidirectional LSTM layers over one time-chunk.

    x_ref:   [TC, B_pad, D_in]   VMEM (time-major chunk), f32
    wih1:    [D_in, 4H] bf16     W_ih^T of layer 1
    whh1:    [H, 4H]    bf16     W_hh^T of layer 1
    b1:      [1, 4H]    f32      b_ih + b_hh of layer 1
    w2:      [2H, 4H]   bf16     [W_ih2^T ; W_hh2^T] fused layer-2 weight
    b2:      [1, 4H]    f32      b_ih + b_hh of layer 2
    lens_ref:[B_pad, 1] int32    valid lengths (0 for padded batch rows)
    o_ref:   [TC, B_pad, H]      layer-2 outputs
    gin_sc:  [TC, B_pad, 4H]     scratch: hoisted layer-1 input projection
    h*/c*:   [B_pad, H]          persistent recurrent state (across chunks)
    """
    TC, B, D_in = x_ref.shape
    H = h1_sc.shape[-1]

    # Recurrent state persists across time-chunks; init on the first chunk only.
    @pl.when(pl.program_id(0) == 0)
    def _init():
        h1_sc[...] = jnp.zeros_like(h1_sc)
        c1_sc[...] = jnp.zeros_like(c1_sc)
        h2_sc[...] = jnp.zeros_like(h2_sc)
        c2_sc[...] = jnp.zeros_like(c2_sc)

    base_t = pl.program_id(0) * TC
    steps = jnp.clip(nsteps_ref[0] - base_t, 0, TC)        # valid steps in chunk

    # Fully padded chunk: only emit the pad_packed_sequence zero padding.
    @pl.when(steps <= 0)
    def _skip():
        o_ref[...] = jnp.zeros_like(o_ref)

    @pl.when(steps > 0)
    def _run():
        # ---- time-independent work, hoisted off the recurrence -------------
        # Layer-1 input projection for the whole chunk as ONE big MXU matmul.
        # NOTE: this reshape is tile-preserving only because B == 8 (one
        # sublane group) and D_in equals the full minor dim of x_ref.
        x2d = x_ref[...].reshape(TC * B, D_in).astype(jnp.bfloat16)
        gin = jnp.dot(x2d, wih1_ref[...],
                      preferred_element_type=jnp.float32) + b1_ref[...]
        gin_sc[...] = gin.reshape(TC, B, 4 * H)

        # Hoist weights / bias / lengths into locals (off the serial chain).
        # TODO(synk): park whh1 / w2 in the MXU with pltpu.matmul_push_rhs and
        #             per-step matmul_acc_lhs/matmul_pop to kill the RHS push.
        whh1 = whh1_ref[...]
        w2 = w2_ref[...]
        b2 = b2_ref[...]
        lens = lens_ref[...]                                  # [B, 1] int32

        # PyTorch gate order (i, f, g, o): lanes [2H, 3H) use tanh, the rest
        # sigmoid.  Single-tanh formulation: sigmoid(x) = 0.5*tanh(0.5x)+0.5,
        # i.e. act = scale * tanh(scale * g) + offset  (scale/offset hoisted).
        lane = lax.broadcasted_iota(jnp.int32, (B, 4 * H), 1)
        g_mask = (lane >= 2 * H) & (lane < 3 * H)
        scale = jnp.where(g_mask, 1.0, 0.5).astype(jnp.float32)
        offset = jnp.where(g_mask, 0.0, 0.5).astype(jnp.float32)

        def step(tt, carry):
            h1, c1, h2, c2 = carry
            # One broadcast per step, reused by every select below.
            validH = jnp.broadcast_to((base_t + tt) < lens, (B, H))

            # ---------------- layer 1 -----------------------------------
            gates1 = gin_sc[tt] + jnp.dot(h1.astype(jnp.bfloat16), whh1,
                                          preferred_element_type=jnp.float32)
            act1 = scale * jnp.tanh(scale * gates1) + offset
            i1 = act1[:, 0 * H:1 * H]
            f1 = act1[:, 1 * H:2 * H]
            g1 = act1[:, 2 * H:3 * H]
            o1 = act1[:, 3 * H:4 * H]
            c1n = f1 * c1 + i1 * g1
            h1n = o1 * jnp.tanh(c1n)
            c1 = jnp.where(validH, c1n, c1)
            h1 = jnp.where(validH, h1n, h1)

            # ---------------- layer 2 (single fused matmul) -----------------
            h12 = jnp.concatenate([h1n, h2], axis=-1).astype(jnp.bfloat16)
            gates2 = jnp.dot(h12, w2, preferred_element_type=jnp.float32) + b2
            act2 = scale * jnp.tanh(scale * gates2) + offset
            i2 = act2[:, 0 * H:1 * H]
            f2 = act2[:, 1 * H:2 * H]
            g2 = act2[:, 2 * H:3 * H]
            o2 = act2[:, 3 * H:4 * H]
            c2n = f2 * c2 + i2 * g2
            h2n = o2 * jnp.tanh(c2n)
            c2 = jnp.where(validH, c2n, c2)
            h2 = jnp.where(validH, h2n, h2)

            # Every tt is written (fixed trip count), so no blanket zero-fill
            # is needed on this path; masked steps write 0 (pad_packed_sequence).
            o_ref[tt] = jnp.where(validH, h2n, 0.0).astype(o_ref.dtype)
            return (h1, c1, h2, c2)

        carry0 = (h1_sc[...], c1_sc[...], h2_sc[...], c2_sc[...])
        h1, c1, h2, c2 = lax.fori_loop(0, TC, step, carry0,
                                       unroll=min(8, TC))
        h1_sc[...] = h1
        c1_sc[...] = c1
        h2_sc[...] = h2
        c2_sc[...] = c2


def _round_up(x, m):
    return (x + m - 1) // m * m


def prepare_lstm_params(params, matmul_dtype=jnp.bfloat16):
    """One-time prep for the fused 2-layer kernel.

    Transposes weights to [D, 4H] / [H, 4H], stacks layer-2's W_ih / W_hh into
    a single [2H, 4H] matrix, folds biases, and stores matmul operands in bf16.
    """
    assert len(params) == 2, "fused kernel implements num_layers=2"
    (w_ih1, w_hh1, b_ih1, b_hh1), (w_ih2, w_hh2, b_ih2, b_hh2) = params
    h4 = w_ih1.shape[0]
    wih1 = jnp.transpose(w_ih1).astype(matmul_dtype)                # [D_in, 4H]
    whh1 = jnp.transpose(w_hh1).astype(matmul_dtype)                # [H,    4H]
    b1 = (b_ih1 + b_hh1).reshape(1, h4).astype(jnp.float32)         # [1,    4H]
    w2 = jnp.concatenate([jnp.transpose(w_ih2), jnp.transpose(w_hh2)],
                         axis=0).astype(matmul_dtype)               # [2H,   4H]
    b2 = (b_ih2 + b_hh2).reshape(1, h4).astype(jnp.float32)         # [1,    4H]
    return (wih1, whh1, b1, w2, b2)


def rnn_encoder_forward(xs, x_lens, prepped_params, batch_first=True,
                        time_chunk=256):
    """RNNEncoder.forward (fast_impl, lstm, num_layers=2, no conv).

    xs:     [B, T, input_dim]  (batch_first=True, as in the PyTorch module)
    x_lens: [B] int32
    Returns (xs_out [B, T, num_units], x_lens).
    """
    # TODO(synk): CNNEncoder front-end, bidirectional/GRU, projection /
    # subsample / residual / nin variants are not exercised by this config.
    wih1, whh1, b1, w2, b2 = prepped_params
    H = whh1.shape[0]

    x = xs
    if batch_first:
        x = jnp.transpose(x, (1, 0, 2))                      # -> [T, B, D]
    T, B, D_in = x.shape

    # Pad batch to a full sublane group (8); padded rows get length 0 so they
    # never update state and their outputs stay 0.  Pad time to a multiple of
    # the chunk size; fully-padded chunks are skipped (zero output).
    B_pad = max(8, _round_up(B, 8))
    TC = min(time_chunk, T)
    T_pad = _round_up(T, TC)
    num_chunks = T_pad // TC

    x_p = jnp.zeros((T_pad, B_pad, D_in), jnp.float32).at[:T, :B, :].set(x)
    lens = jnp.zeros((B_pad, 1), jnp.int32).at[:B, 0].set(
        x_lens.astype(jnp.int32))
    nsteps = jnp.reshape(jnp.max(x_lens).astype(jnp.int32), (1,))

    grid_spec = pltpu.PrefetchScalarGridSpec(
        num_scalar_prefetch=1,                               # nsteps -> SMEM
        grid=(num_chunks,),
        in_specs=[
            pl.BlockSpec((B_pad, 1), lambda c, n: (0, 0)),             # lens
            pl.BlockSpec((TC, B_pad, D_in), lambda c, n: (c, 0, 0)),   # x chunk
            pl.BlockSpec(wih1.shape, lambda c, n: (0, 0)),
            pl.BlockSpec(whh1.shape, lambda c, n: (0, 0)),
            pl.BlockSpec(b1.shape, lambda c, n: (0, 0)),
            pl.BlockSpec(w2.shape, lambda c, n: (0, 0)),
            pl.BlockSpec(b2.shape, lambda c, n: (0, 0)),
        ],
        out_specs=pl.BlockSpec((TC, B_pad, H), lambda c, n: (c, 0, 0)),
        scratch_shapes=[
            pltpu.VMEM((TC, B_pad, 4 * H), jnp.float32),     # layer-1 in-proj
            pltpu.VMEM((B_pad, H), jnp.float32),             # h1
            pltpu.VMEM((B_pad, H), jnp.float32),             # c1
            pltpu.VMEM((B_pad, H), jnp.float32),             # h2
            pltpu.VMEM((B_pad, H), jnp.float32),             # c2
        ],
    )

    out = pl.pallas_call(
        _fused_lstm2_kernel,
        out_shape=jax.ShapeDtypeStruct((T_pad, B_pad, H), jnp.float32),
        grid_spec=grid_spec,
        # Time is a recurrence -> "arbitrary".  Per-chunk VMEM at TC=256,
        # B_pad=8 is ~1.5 MiB (x + o double-buffered + gin scratch), far
        # below the default scoped limit on v5e/v6e/v7x.
        # TODO(synk): batch-parallel leading grid axis for v7x (2 TCs) once
        #             B_pad >= 16.
        compiler_params=pltpu.CompilerParams(
            dimension_semantics=("arbitrary",)),
    )(nsteps, lens, x_p, wih1, whh1, b1, w2, b2)

    out = out[:T, :B, :]
    if batch_first:
        out = jnp.transpose(out, (1, 0, 2))                  # -> [B, T, H]
    return out, x_lens


# ---------------- pure-JAX reference (for correctness check) ----------------
def rnn_encoder_reference(xs, x_lens, params):
    x = xs                                                   # [B, T, D]
    B, T, _ = x.shape
    for (w_ih, w_hh, b_ih, b_hh) in params:
        H = w_hh.shape[1]

        def cell(carry, inp):
            h, c = carry
            x_t, t = inp
            gates = x_t @ w_ih.T + h @ w_hh.T + b_ih + b_hh
            i, f, g, o = jnp.split(gates, 4, axis=-1)
            i = jax.nn.sigmoid(i)
            f = jax.nn.sigmoid(f)
            g = jnp.tanh(g)
            o = jax.nn.sigmoid(o)
            c_new = f * c + i * g
            h_new = o * jnp.tanh(c_new)
            valid = (t < x_lens)[:, None]
            h = jnp.where(valid, h_new, h)
            c = jnp.where(valid, c_new, c)
            y = jnp.where(valid, h_new, 0.0)
            return (h, c), y

        x_tm = jnp.transpose(x, (1, 0, 2))
        (_, _), ys = lax.scan(cell,
                              (jnp.zeros((B, H), jnp.float32),
                               jnp.zeros((B, H), jnp.float32)),
                              (x_tm, jnp.arange(T)))
        x = jnp.transpose(ys, (1, 0, 2))
    return x, x_lens


def init_lstm_params(key, input_dim, num_units, num_layers):
    """Deterministic init matching nn.LSTM's U(-1/sqrt(H), 1/sqrt(H))."""
    params = []
    stdv = 1.0 / float(num_units) ** 0.5
    d_in = input_dim
    for _ in range(num_layers):
        key, k1, k2, k3, k4 = jax.random.split(key, 5)
        w_ih = jax.random.uniform(k1, (4 * num_units, d_in), jnp.float32, -stdv, stdv)
        w_hh = jax.random.uniform(k2, (4 * num_units, num_units), jnp.float32, -stdv, stdv)
        b_ih = jax.random.uniform(k3, (4 * num_units,), jnp.float32, -stdv, stdv)
        b_hh = jax.random.uniform(k4, (4 * num_units,), jnp.float32, -stdv, stdv)
        params.append((w_ih, w_hh, b_ih, b_hh))
        d_in = num_units
    return params


if __name__ == "__main__":
    B, T, input_dim = 2, 8, 16
    num_units, num_layers = 32, 2

    key = jax.random.PRNGKey(0)
    key, kx = jax.random.split(key)
    xs = jax.random.normal(kx, (B, T, input_dim), jnp.float32)
    x_lens = jnp.array([8, 6], dtype=jnp.int32)    # sorted descending (pack semantics)

    params = init_lstm_params(key, input_dim, num_units, num_layers)
    prepped = prepare_lstm_params(params)          # one-time weight prep (bf16)

    out, out_lens = rnn_encoder_forward(xs, x_lens, prepped, batch_first=True)
    out = jax.block_until_ready(out)

    ref, _ = rnn_encoder_reference(xs, x_lens, params)
    assert out.shape == (B, T, num_units)
    # bf16 matmul operands -> loosened tolerance vs. the f32 reference.
    assert jnp.allclose(out, ref, atol=2e-2, rtol=2e-2), "mismatch vs reference"
    print("KERNEL_OK")
</pallas_src>

<mosaic_0001>
module attributes {stable_mosaic.version = 11 : i64} {
  func.func @_fused_lstm2_kernel(%arg0: i32, %arg1: memref<1xi32, #tpu.memory_space<smem>>, %arg2: memref<8x1xi32, #tpu.memory_space<vmem>>, %arg3: memref<8x8x16xf32, #tpu.memory_space<vmem>>, %arg4: memref<16x128xbf16, #tpu.memory_space<vmem>>, %arg5: memref<32x128xbf16, #tpu.memory_space<vmem>>, %arg6: memref<1x128xf32, #tpu.memory_space<vmem>>, %arg7: memref<64x128xbf16, #tpu.memory_space<vmem>>, %arg8: memref<1x128xf32, #tpu.memory_space<vmem>>, %arg9: memref<8x8x32xf32, #tpu.memory_space<vmem>>, %arg10: memref<8x8x128xf32, #tpu.memory_space<vmem>>, %arg11: memref<8x32xf32, #tpu.memory_space<vmem>>, %arg12: memref<8x32xf32, #tpu.memory_space<vmem>>, %arg13: memref<8x32xf32, #tpu.memory_space<vmem>>, %arg14: memref<8x32xf32, #tpu.memory_space<vmem>>) attributes {dimension_semantics = [#tpu.dimension_semantics<arbitrary>], iteration_bounds = array<i64: 1>, scalar_prefetch = 1 : i64, scratch_operands = 5 : i64, tpu.core_type = #tpu.core_type<tc>, window_params = [{pipeline_mode = #tpu.pipeline_mode<synchronous>, transform_indices = @transform_0, window_bounds = array<i64: 8, 1>}, {transform_indices = @transform_1, window_bounds = array<i64: 8, 8, 16>}, {pipeline_mode = #tpu.pipeline_mode<synchronous>, transform_indices = @transform_2, window_bounds = array<i64: 16, 128>}, {pipeline_mode = #tpu.pipeline_mode<synchronous>, transform_indices = @transform_3, window_bounds = array<i64: 32, 128>}, {pipeline_mode = #tpu.pipeline_mode<synchronous>, transform_indices = @transform_4, window_bounds = array<i64: 1, 128>}, {pipeline_mode = #tpu.pipeline_mode<synchronous>, transform_indices = @transform_5, window_bounds = array<i64: 64, 128>}, {pipeline_mode = #tpu.pipeline_mode<synchronous>, transform_indices = @transform_6, window_bounds = array<i64: 1, 128>}, {transform_indices = @transform_7, window_bounds = array<i64: 8, 8, 32>}]} {
    %c0_i32 = arith.constant 0 : i32
    %0 = arith.cmpi eq, %arg0, %c0_i32 : i32
    %1 = arith.extui %0 : i1 to i32
    %c0_i32_0 = arith.constant 0 : i32
    %2 = arith.cmpi ne, %1, %c0_i32_0 : i32
    scf.if %2 {
      %cst = arith.constant 0.000000e+00 : f32
      %14 = vector.broadcast %cst : f32 to vector<8x32xf32>
      %c0_7 = arith.constant 0 : index
      %c0_8 = arith.constant 0 : index
      %15 = vector.load %arg11[%c0_7, %c0_8] : memref<8x32xf32, #tpu.memory_space<vmem>>, vector<8x32xf32>
      tpu.vector_store %arg11[%c0_7, %c0_8], %14 {strides = array<i32>} : memref<8x32xf32, #tpu.memory_space<vmem>>, vector<8x32xf32>,
      %cst_9 = arith.constant 0.000000e+00 : f32
      %16 = vector.broadcast %cst_9 : f32 to vector<8x32xf32>
      %c0_10 = arith.constant 0 : index
      %c0_11 = arith.constant 0 : index
      %17 = vector.load %arg12[%c0_10, %c0_11] : memref<8x32xf32, #tpu.memory_space<vmem>>, vector<8x32xf32>
      tpu.vector_store %arg12[%c0_10, %c0_11], %16 {strides = array<i32>} : memref<8x32xf32, #tpu.memory_space<vmem>>, vector<8x32xf32>,
      %cst_12 = arith.constant 0.000000e+00 : f32
      %18 = vector.broadcast %cst_12 : f32 to vector<8x32xf32>
      %c0_13 = arith.constant 0 : index
      %c0_14 = arith.constant 0 : index
      %19 = vector.load %arg13[%c0_13, %c0_14] : memref<8x32xf32, #tpu.memory_space<vmem>>, vector<8x32xf32>
      tpu.vector_store %arg13[%c0_13, %c0_14], %18 {strides = array<i32>} : memref<8x32xf32, #tpu.memory_space<vmem>>, vector<8x32xf32>,
      %cst_15 = arith.constant 0.000000e+00 : f32
      %20 = vector.broadcast %cst_15 : f32 to vector<8x32xf32>
      %c0_16 = arith.constant 0 : index
      %c0_17 = arith.constant 0 : index
      %21 = vector.load %arg14[%c0_16, %c0_17] : memref<8x32xf32, #tpu.memory_space<vmem>>, vector<8x32xf32>
      tpu.vector_store %arg14[%c0_16, %c0_17], %20 {strides = array<i32>} : memref<8x32xf32, #tpu.memory_space<vmem>>, vector<8x32xf32>,
    } else {
    }
    %c8_i32 = arith.constant 8 : i32
    %3 = arith.muli %arg0, %c8_i32 : i32
    %c0 = arith.constant 0 : index
    %4 = memref.load %arg1[%c0] : memref<1xi32, #tpu.memory_space<smem>>
    %5 = arith.subi %4, %3 : i32
    %c0_i32_1 = arith.constant 0 : i32
    %c8_i32_2 = arith.constant 8 : i32
    %6 = arith.maxsi %c0_i32_1, %5 : i32
    %7 = arith.minsi %c8_i32_2, %6 : i32
    %c0_i32_3 = arith.constant 0 : i32
    %8 = arith.cmpi sle, %7, %c0_i32_3 : i32
    %9 = arith.extui %8 : i1 to i32
    %c0_i32_4 = arith.constant 0 : i32
    %10 = arith.cmpi ne, %9, %c0_i32_4 : i32
    scf.if %10 {
      %cst = arith.constant 0.000000e+00 : f32
      %14 = vector.broadcast %cst : f32 to vector<8x8x32xf32>
      %c0_7 = arith.constant 0 : index
      %c0_8 = arith.constant 0 : index
      %c0_9 = arith.constant 0 : index
      %15 = vector.load %arg9[%c0_7, %c0_8, %c0_9] : memref<8x8x32xf32, #tpu.memory_space<vmem>>, vector<8x8x32xf32>
      tpu.vector_store %arg9[%c0_7, %c0_8, %c0_9], %14 {strides = array<i32>} : memref<8x8x32xf32, #tpu.memory_space<vmem>>, vector<8x8x32xf32>,
    } else {
    }
    %c0_i32_5 = arith.constant 0 : i32
    %11 = arith.cmpi sgt, %7, %c0_i32_5 : i32
    %12 = arith.extui %11 : i1 to i32
    %c0_i32_6 = arith.constant 0 : i32
    %13 = arith.cmpi ne, %12, %c0_i32_6 : i32
    scf.if %13 {
      %c0_7 = arith.constant 0 : index
      %c0_8 = arith.constant 0 : index
      %c0_9 = arith.constant 0 : index
      %14 = vector.load %arg3[%c0_7, %c0_8, %c0_9] : memref<8x8x16xf32, #tpu.memory_space<vmem>>, vector<8x8x16xf32>
      %15 = vector.shape_cast %14 : vector<8x8x16xf32> to vector<64x16xf32>
      %16 = arith.truncf %15 : vector<64x16xf32> to vector<64x16xbf16>
      %c0_10 = arith.constant 0 : index
      %c0_11 = arith.constant 0 : index
      %17 = vector.load %arg4[%c0_10, %c0_11] : memref<16x128xbf16, #tpu.memory_space<vmem>>, vector<16x128xbf16>
      %cst = arith.constant dense<0.000000e+00> : vector<64x128xf32>
      %18 = tpu.matmul %16, %17, %cst {dimension_numbers = #tpu.dot_dimension_numbers<[1], [0], [0], [1], [0, 0, 1, 1], [], []>} : vector<64x16xbf16>, vector<16x128xbf16>, vector<64x128xf32> -> vector<64x128xf32>
      %c0_12 = arith.constant 0 : index
      %c0_13 = arith.constant 0 : index
      %19 = vector.load %arg6[%c0_12, %c0_13] : memref<1x128xf32, #tpu.memory_space<vmem>>, vector<1x128xf32>
      %20 = vector.broadcast %19 : vector<1x128xf32> to vector<64x128xf32>
      %21 = arith.addf %18, %20 : vector<64x128xf32>
      %22 = vector.shape_cast %21 : vector<64x128xf32> to vector<8x8x128xf32>
      %c0_14 = arith.constant 0 : index
      %c0_15 = arith.constant 0 : index
      %c0_16 = arith.constant 0 : index
      %23 = vector.load %arg10[%c0_14, %c0_15, %c0_16] : memref<8x8x128xf32, #tpu.memory_space<vmem>>, vector<8x8x128xf32>
      tpu.vector_store %arg10[%c0_14, %c0_15, %c0_16], %22 {strides = array<i32>} : memref<8x8x128xf32, #tpu.memory_space<vmem>>, vector<8x8x128xf32>,
      %c0_17 = arith.constant 0 : index
      %c0_18 = arith.constant 0 : index
      %24 = vector.load %arg5[%c0_17, %c0_18] : memref<32x128xbf16, #tpu.memory_space<vmem>>, vector<32x128xbf16>
      %c0_19 = arith.constant 0 : index
      %c0_20 = arith.constant 0 : index
      %25 = vector.load %arg7[%c0_19, %c0_20] : memref<64x128xbf16, #tpu.memory_space<vmem>>, vector<64x128xbf16>
      %c0_21 = arith.constant 0 : index
      %c0_22 = arith.constant 0 : index
      %26 = vector.load %arg8[%c0_21, %c0_22] : memref<1x128xf32, #tpu.memory_space<vmem>>, vector<1x128xf32>
      %c0_23 = arith.constant 0 : index
      %c0_24 = arith.constant 0 : index
      %27 = vector.load %arg2[%c0_23, %c0_24] : memref<8x1xi32, #tpu.memory_space<vmem>>, vector<8x1xi32>
      %28 = tpu.iota {dimensions = array<i32: 1>} : vector<8x128xi32>
      %c64_i32 = arith.constant 64 : i32
      %29 = vector.broadcast %c64_i32 : i32 to vector<8x128xi32>
      %30 = arith.cmpi sge, %28, %29 : vector<8x128xi32>
      %c96_i32 = arith.constant 96 : i32
      %31 = vector.broadcast %c96_i32 : i32 to vector<8x128xi32>
      %32 = arith.cmpi slt, %28, %31 : vector<8x128xi32>
      %33 = arith.andi %30, %32 : vector<8x128xi1>
      %cst_25 = arith.constant 1.000000e+00 : f32
      %cst_26 = arith.constant 5.000000e-01 : f32
      %34 = vector.broadcast %cst_25 : f32 to vector<8x128xf32>
      %35 = vector.broadcast %cst_26 : f32 to vector<8x128xf32>
      %36 = arith.select %33, %34, %35 : vector<8x128xi1>, vector<8x128xf32>
      %cst_27 = arith.constant 0.000000e+00 : f32
      %cst_28 = arith.constant 5.000000e-01 : f32
      %37 = vector.broadcast %cst_27 : f32 to vector<8x128xf32>
      %38 = vector.broadcast %cst_28 : f32 to vector<8x128xf32>
      %39 = arith.select %33, %37, %38 : vector<8x128xi1>, vector<8x128xf32>
      %c0_29 = arith.constant 0 : index
      %c0_30 = arith.constant 0 : index
      %40 = vector.load %arg11[%c0_29, %c0_30] : memref<8x32xf32, #tpu.memory_space<vmem>>, vector<8x32xf32>
      %c0_31 = arith.constant 0 : index
      %c0_32 = arith.constant 0 : index
      %41 = vector.load %arg12[%c0_31, %c0_32] : memref<8x32xf32, #tpu.memory_space<vmem>>, vector<8x32xf32>
      %c0_33 = arith.constant 0 : index
      %c0_34 = arith.constant 0 : index
      %42 = vector.load %arg13[%c0_33, %c0_34] : memref<8x32xf32, #tpu.memory_space<vmem>>, vector<8x32xf32>
      %c0_35 = arith.constant 0 : index
      %c0_36 = arith.constant 0 : index
      %43 = vector.load %arg14[%c0_35, %c0_36] : memref<8x32xf32, #tpu.memory_space<vmem>>, vector<8x32xf32>
      %c0_i32_37 = arith.constant 0 : i32
      %44 = arith.addi %3, %c0_i32_37 : i32
      %45 = vector.broadcast %44 : i32 to vector<8x1xi32>
      %46 = arith.cmpi slt, %45, %27 : vector<8x1xi32>
      %47 = vector.shape_cast %46 : vector<8x1xi1> to vector<8x1xi1>
      %48 = vector.broadcast %47 : vector<8x1xi1> to vector<8x32xi1>
      %49 = arith.index_cast %c0_i32_37 : i32 to index
      %c0_38 = arith.constant 0 : index
      %c0_39 = arith.constant 0 : index
      %50 = vector.load %arg10[%49, %c0_38, %c0_39] : memref<8x8x128xf32, #tpu.memory_space<vmem>>, vector<1x8x128xf32>
      %51 = vector.shape_cast %50 : vector<1x8x128xf32> to vector<8x128xf32>
      %52 = arith.truncf %40 : vector<8x32xf32> to vector<8x32xbf16>
      %cst_40 = arith.constant dense<0.000000e+00> : vector<8x128xf32>
      %53 = tpu.matmul %52, %24, %cst_40 {dimension_numbers = #tpu.dot_dimension_numbers<[1], [0], [0], [1], [0, 0, 1, 1], [], []>} : vector<8x32xbf16>, vector<32x128xbf16>, vector<8x128xf32> -> vector<8x128xf32>
      %54 = arith.addf %51, %53 : vector<8x128xf32>
      %55 = arith.mulf %36, %54 : vector<8x128xf32>
      %56 = math.tanh %55 : vector<8x128xf32>
      %57 = arith.mulf %36, %56 : vector<8x128xf32>
      %58 = arith.addf %57, %39 : vector<8x128xf32>
      %59 = vector.extract_strided_slice %58 {offsets = [0, 0], sizes = [8, 32], strides = [1, 1]} : vector<8x128xf32> to vector<8x32xf32>
      %60 = vector.extract_strided_slice %58 {offsets = [0, 32], sizes = [8, 32], strides = [1, 1]} : vector<8x128xf32> to vector<8x32xf32>
      %61 = vector.extract_strided_slice %58 {offsets = [0, 64], sizes = [8, 32], strides = [1, 1]} : vector<8x128xf32> to vector<8x32xf32>
      %62 = vector.extract_strided_slice %58 {offsets = [0, 96], sizes = [8, 32], strides = [1, 1]} : vector<8x128xf32> to vector<8x32xf32>
      %63 = arith.mulf %60, %41 : vector<8x32xf32>
      %64 = arith.mulf %59, %61 : vector<8x32xf32>
      %65 = arith.addf %63, %64 : vector<8x32xf32>
      %66 = math.tanh %65 : vector<8x32xf32>
      %67 = arith.mulf %62, %66 : vector<8x32xf32>
      %68 = arith.select %48, %65, %41 : vector<8x32xi1>, vector<8x32xf32>
      %69 = arith.select %48, %67, %40 : vector<8x32xi1>, vector<8x32xf32>
      %70 = tpu.concatenate %67, %42 in 1 : vector<8x32xf32>, vector<8x32xf32> -> vector<8x64xf32>
      %71 = arith.truncf %70 : vector<8x64xf32> to vector<8x64xbf16>
      %cst_41 = arith.constant dense<0.000000e+00> : vector<8x128xf32>
      %72 = tpu.matmul %71, %25, %cst_41 {dimension_numbers = #tpu.dot_dimension_numbers<[1], [0], [0], [1], [0, 0, 1, 1], [], []>} : vector<8x64xbf16>, vector<64x128xbf16>, vector<8x128xf32> -> vector<8x128xf32>
      %73 = vector.broadcast %26 : vector<1x128xf32> to vector<8x128xf32>
      %74 = arith.addf %72, %73 : vector<8x128xf32>
      %75 = arith.mulf %36, %74 : vector<8x128xf32>
      %76 = math.tanh %75 : vector<8x128xf32>
      %77 = arith.mulf %36, %76 : vector<8x128xf32>
      %78 = arith.addf %77, %39 : vector<8x128xf32>
      %79 = vector.extract_strided_slice %78 {offsets = [0, 0], sizes = [8, 32], strides = [1, 1]} : vector<8x128xf32> to vector<8x32xf32>
      %80 = vector.extract_strided_slice %78 {offsets = [0, 32], sizes = [8, 32], strides = [1, 1]} : vector<8x128xf32> to vector<8x32xf32>
      %81 = vector.extract_strided_slice %78 {offsets = [0, 64], sizes = [8, 32], strides = [1, 1]} : vector<8x128xf32> to vector<8x32xf32>
      %82 = vector.extract_strided_slice %78 {offsets = [0, 96], sizes = [8, 32], strides = [1, 1]} : vector<8x128xf32> to vector<8x32xf32>
      %83 = arith.mulf %80, %43 : vector<8x32xf32>
      %84 = arith.mulf %79, %81 : vector<8x32xf32>
      %85 = arith.addf %83, %84 : vector<8x32xf32>
      %86 = math.tanh %85 : vector<8x32xf32>
      %87 = arith.mulf %82, %86 : vector<8x32xf32>
      %88 = arith.select %48, %85, %43 : vector<8x32xi1>, vector<8x32xf32>
      %89 = arith.select %48, %87, %42 : vector<8x32xi1>, vector<8x32xf32>
      %cst_42 = arith.constant 0.000000e+00 : f32
      %90 = vector.broadcast %cst_42 : f32 to vector<8x32xf32>
      %91 = arith.select %48, %87, %90 : vector<8x32xi1>, vector<8x32xf32>
      %92 = arith.index_cast %c0_i32_37 : i32 to index
      %c0_43 = arith.constant 0 : index
      %c0_44 = arith.constant 0 : index
      %93 = vector.load %arg9[%92, %c0_43, %c0_44] : memref<8x8x32xf32, #tpu.memory_space<vmem>>, vector<1x8x32xf32>
      %94 = vector.shape_cast %93 : vector<1x8x32xf32> to vector<8x32xf32>
      %95 = vector.shape_cast %91 : vector<8x32xf32> to vector<1x8x32xf32>
      tpu.vector_store %arg9[%92, %c0_43, %c0_44], %95 {strides = array<i32>} : memref<8x8x32xf32, #tpu.memory_space<vmem>>, vector<1x8x32xf32>,
      %c1_i32 = arith.constant 1 : i32
      %96 = arith.addi %3, %c1_i32 : i32
      %97 = vector.broadcast %96 : i32 to vector<8x1xi32>
      %98 = arith.cmpi slt, %97, %27 : vector<8x1xi32>
      %99 = vector.shape_cast %98 : vector<8x1xi1> to vector<8x1xi1>
      %100 = vector.broadcast %99 : vector<8x1xi1> to vector<8x32xi1>
      %101 = arith.index_cast %c1_i32 : i32 to index
      %c0_45 = arith.constant 0 : index
      %c0_46 = arith.constant 0 : index
      %102 = vector.load %arg10[%101, %c0_45, %c0_46] : memref<8x8x128xf32, #tpu.memory_space<vmem>>, vector<1x8x128xf32>
      %103 = vector.shape_cast %102 : vector<1x8x128xf32> to vector<8x128xf32>
      %104 = arith.truncf %69 : vector<8x32xf32> to vector<8x32xbf16>
      %cst_47 = arith.constant dense<0.000000e+00> : vector<8x128xf32>
      %105 = tpu.matmul %104, %24, %cst_47 {dimension_numbers = #tpu.dot_dimension_numbers<[1], [0], [0], [1], [0, 0, 1, 1], [], []>} : vector<8x32xbf16>, vector<32x128xbf16>, vector<8x128xf32> -> vector<8x128xf32>
      %106 = arith.addf %103, %105 : vector<8x128xf32>
      %107 = arith.mulf %36, %106 : vector<8x128xf32>
      %108 = math.tanh %107 : vector<8x128xf32>
      %109 = arith.mulf %36, %108 : vector<8x128xf32>
      %110 = arith.addf %109, %39 : vector<8x128xf32>
      %111 = vector.extract_strided_slice %110 {offsets = [0, 0], sizes = [8, 32], strides = [1, 1]} : vector<8x128xf32> to vector<8x32xf32>
      %112 = vector.extract_strided_slice %110 {offsets = [0, 32], sizes = [8, 32], strides = [1, 1]} : vector<8x128xf32> to vector<8x32xf32>
      %113 = vector.extract_strided_slice %110 {offsets = [0, 64], sizes = [8, 32], strides = [1, 1]} : vector<8x128xf32> to vector<8x32xf32>
      %114 = vector.extract_strided_slice %110 {offsets = [0, 96], sizes = [8, 32], strides = [1, 1]} : vector<8x128xf32> to vector<8x32xf32>
      %115 = arith.mulf %112, %68 : vector<8x32xf32>
      %116 = arith.mulf %111, %113 : vector<8x32xf32>
      %117 = arith.addf %115, %116 : vector<8x32xf32>
      %118 = math.tanh %117 : vector<8x32xf32>
      %119 = arith.mulf %114, %118 : vector<8x32xf32>
      %120 = arith.select %100, %117, %68 : vector<8x32xi1>, vector<8x32xf32>
      %121 = arith.select %100, %119, %69 : vector<8x32xi1>, vector<8x32xf32>
      %122 = tpu.concatenate %119, %89 in 1 : vector<8x32xf32>, vector<8x32xf32> -> vector<8x64xf32>
      %123 = arith.truncf %122 : vector<8x64xf32> to vector<8x64xbf16>
      %cst_48 = arith.constant dense<0.000000e+00> : vector<8x128xf32>
      %124 = tpu.matmul %123, %25, %cst_48 {dimension_numbers = #tpu.dot_dimension_numbers<[1], [0], [0], [1], [0, 0, 1, 1], [], []>} : vector<8x64xbf16>, vector<64x128xbf16>, vector<8x128xf32> -> vector<8x128xf32>
      %125 = vector.broadcast %26 : vector<1x128xf32> to vector<8x128xf32>
      %126 = arith.addf %124, %125 : vector<8x128xf32>
      %127 = arith.mulf %36, %126 : vector<8x128xf32>
      %128 = math.tanh %127 : vector<8x128xf32>
      %129 = arith.mulf %36, %128 : vector<8x128xf32>
      %130 = arith.addf %129, %39 : vector<8x128xf32>
      %131 = vector.extract_strided_slice %130 {offsets = [0, 0], sizes = [8, 32], strides = [1, 1]} : vector<8x128xf32> to vector<8x32xf32>
      %132 = vector.extract_strided_slice %130 {offsets = [0, 32], sizes = [8, 32], strides = [1, 1]} : vector<8x128xf32> to vector<8x32xf32>
      %133 = vector.extract_strided_slice %130 {offsets = [0, 64], sizes = [8, 32], strides = [1, 1]} : vector<8x128xf32> to vector<8x32xf32>
      %134 = vector.extract_strided_slice %130 {offsets = [0, 96], sizes = [8, 32], strides = [1, 1]} : vector<8x128xf32> to vector<8x32xf32>
      %135 = arith.mulf %132, %88 : vector<8x32xf32>
      %136 = arith.mulf %131, %133 : vector<8x32xf32>
      %137 = arith.addf %135, %136 : vector<8x32xf32>
      %138 = math.tanh %137 : vector<8x32xf32>
      %139 = arith.mulf %134, %138 : vector<8x32xf32>
      %140 = arith.select %100, %137, %88 : vector<8x32xi1>, vector<8x32xf32>
      %141 = arith.select %100, %139, %89 : vector<8x32xi1>, vector<8x32xf32>
      %cst_49 = arith.constant 0.000000e+00 : f32
      %142 = vector.broadcast %cst_49 : f32 to vector<8x32xf32>
      %143 = arith.select %100, %139, %142 : vector<8x32xi1>, vector<8x32xf32>
      %144 = arith.index_cast %c1_i32 : i32 to index
      %c0_50 = arith.constant 0 : index
      %c0_51 = arith.constant 0 : index
      %145 = vector.load %arg9[%144, %c0_50, %c0_51] : memref<8x8x32xf32, #tpu.memory_space<vmem>>, vector<1x8x32xf32>
      %146 = vector.shape_cast %145 : vector<1x8x32xf32> to vector<8x32xf32>
      %147 = vector.shape_cast %143 : vector<8x32xf32> to vector<1x8x32xf32>
      tpu.vector_store %arg9[%144, %c0_50, %c0_51], %147 {strides = array<i32>} : memref<8x8x32xf32, #tpu.memory_space<vmem>>, vector<1x8x32xf32>,
      %c2_i32 = arith.constant 2 : i32
      %148 = arith.addi %3, %c2_i32 : i32
      %149 = vector.broadcast %148 : i32 to vector<8x1xi32>
      %150 = arith.cmpi slt, %149, %27 : vector<8x1xi32>
      %151 = vector.shape_cast %150 : vector<8x1xi1> to vector<8x1xi1>
      %152 = vector.broadcast %151 : vector<8x1xi1> to vector<8x32xi1>
      %153 = arith.index_cast %c2_i32 : i32 to index
      %c0_52 = arith.constant 0 : index
      %c0_53 = arith.constant 0 : index
      %154 = vector.load %arg10[%153, %c0_52, %c0_53] : memref<8x8x128xf32, #tpu.memory_space<vmem>>, vector<1x8x128xf32>
      %155 = vector.shape_cast %154 : vector<1x8x128xf32> to vector<8x128xf32>
      %156 = arith.truncf %121 : vector<8x32xf32> to vector<8x32xbf16>
      %cst_54 = arith.constant dense<0.000000e+00> : vector<8x128xf32>
      %157 = tpu.matmul %156, %24, %cst_54 {dimension_numbers = #tpu.dot_dimension_numbers<[1], [0], [0], [1], [0, 0, 1, 1], [], []>} : vector<8x32xbf16>, vector<32x128xbf16>, vector<8x128xf32> -> vector<8x128xf32>
      %158 = arith.addf %155, %157 : vector<8x128xf32>
      %159 = arith.mulf %36, %158 : vector<8x128xf32>
      %160 = math.tanh %159 : vector<8x128xf32>
      %161 = arith.mulf %36, %160 : vector<8x128xf32>
      %162 = arith.addf %161, %39 : vector<8x128xf32>
      %163 = vector.extract_strided_slice %162 {offsets = [0, 0], sizes = [8, 32], strides = [1, 1]} : vector<8x128xf32> to vector<8x32xf32>
      %164 = vector.extract_strided_slice %162 {offsets = [0, 32], sizes = [8, 32], strides = [1, 1]} : vector<8x128xf32> to vector<8x32xf32>
      %165 = vector.extract_strided_slice %162 {offsets = [0, 64], sizes = [8, 32], strides = [1, 1]} : vector<8x128xf32> to vector<8x32xf32>
      %166 = vector.extract_strided_slice %162 {offsets = [0, 96], sizes = [8, 32], strides = [1, 1]} : vector<8x128xf32> to vector<8x32xf32>
      %167 = arith.mulf %164, %120 : vector<8x32xf32>
      %168 = arith.mulf %163, %165 : vector<8x32xf32>
      %169 = arith.addf %167, %168 : vector<8x32xf32>
      %170 = math.tanh %169 : vector<8x32xf32>
      %171 = arith.mulf %166, %170 : vector<8x32xf32>
      %172 = arith.select %152, %169, %120 : vector<8x32xi1>, vector<8x32xf32>
      %173 = arith.select %152, %171, %121 : vector<8x32xi1>, vector<8x32xf32>
      %174 = tpu.concatenate %171, %141 in 1 : vector<8x32xf32>, vector<8x32xf32> -> vector<8x64xf32>
      %175 = arith.truncf %174 : vector<8x64xf32> to vector<8x64xbf16>
      %cst_55 = arith.constant dense<0.000000e+00> : vector<8x128xf32>
      %176 = tpu.matmul %175, %25, %cst_55 {dimension_numbers = #tpu.dot_dimension_numbers<[1], [0], [0], [1], [0, 0, 1, 1], [], []>} : vector<8x64xbf16>, vector<64x128xbf16>, vector<8x128xf32> -> vector<8x128xf32>
      %177 = vector.broadcast %26 : vector<1x128xf32> to vector<8x128xf32>
      %178 = arith.addf %176, %177 : vector<8x128xf32>
      %179 = arith.mulf %36, %178 : vector<8x128xf32>
      %180 = math.tanh %179 : vector<8x128xf32>
      %181 = arith.mulf %36, %180 : vector<8x128xf32>
      %182 = arith.addf %181, %39 : vector<8x128xf32>
      %183 = vector.extract_strided_slice %182 {offsets = [0, 0], sizes = [8, 32], strides = [1, 1]} : vector<8x128xf32> to vector<8x32xf32>
      %184 = vector.extract_strided_slice %182 {offsets = [0, 32], sizes = [8, 32], strides = [1, 1]} : vector<8x128xf32> to vector<8x32xf32>
      %185 = vector.extract_strided_slice %182 {offsets = [0, 64], sizes = [8, 32], strides = [1, 1]} : vector<8x128xf32> to vector<8x32xf32>
      %186 = vector.extract_strided_slice %182 {offsets = [0, 96], sizes = [8, 32], strides = [1, 1]} : vector<8x128xf32> to vector<8x32xf32>
      %187 = arith.mulf %184, %140 : vector<8x32xf32>
      %188 = arith.mulf %183, %185 : vector<8x32xf32>
      %189 = arith.addf %187, %188 : vector<8x32xf32>
      %190 = math.tanh %189 : vector<8x32xf32>
      %191 = arith.mulf %186, %190 : vector<8x32xf32>
      %192 = arith.select %152, %189, %140 : vector<8x32xi1>, vector<8x32xf32>
      %193 = arith.select %152, %191, %141 : vector<8x32xi1>, vector<8x32xf32>
      %cst_56 = arith.constant 0.000000e+00 : f32
      %194 = vector.broadcast %cst_56 : f32 to vector<8x32xf32>
      %195 = arith.select %152, %191, %194 : vector<8x32xi1>, vector<8x32xf32>
      %196 = arith.index_cast %c2_i32 : i32 to index
      %c0_57 = arith.constant 0 : index
      %c0_58 = arith.constant 0 : index
      %197 = vector.load %arg9[%196, %c0_57, %c0_58] : memref<8x8x32xf32, #tpu.memory_space<vmem>>, vector<1x8x32xf32>
      %198 = vector.shape_cast %197 : vector<1x8x32xf32> to vector<8x32xf32>
      %199 = vector.shape_cast %195 : vector<8x32xf32> to vector<1x8x32xf32>
      tpu.vector_store %arg9[%196, %c0_57, %c0_58], %199 {strides = array<i32>} : memref<8x8x32xf32, #tpu.memory_space<vmem>>, vector<1x8x32xf32>,
      %c3_i32 = arith.constant 3 : i32
      %200 = arith.addi %3, %c3_i32 : i32
      %201 = vector.broadcast %200 : i32 to vector<8x1xi32>
      %202 = arith.cmpi slt, %201, %27 : vector<8x1xi32>
      %203 = vector.shape_cast %202 : vector<8x1xi1> to vector<8x1xi1>
      %204 = vector.broadcast %203 : vector<8x1xi1> to vector<8x32xi1>
      %205 = arith.index_cast %c3_i32 : i32 to index
      %c0_59 = arith.constant 0 : index
      %c0_60 = arith.constant 0 : index
      %206 = vector.load %arg10[%205, %c0_59, %c0_60] : memref<8x8x128xf32, #tpu.memory_space<vmem>>, vector<1x8x128xf32>
      %207 = vector.shape_cast %206 : vector<1x8x128xf32> to vector<8x128xf32>
      %208 = arith.truncf %173 : vector<8x32xf32> to vector<8x32xbf16>
      %cst_61 = arith.constant dense<0.000000e+00> : vector<8x128xf32>
      %209 = tpu.matmul %208, %24, %cst_61 {dimension_numbers = #tpu.dot_dimension_numbers<[1], [0], [0], [1], [0, 0, 1, 1], [], []>} : vector<8x32xbf16>, vector<32x128xbf16>, vector<8x128xf32> -> vector<8x128xf32>
      %210 = arith.addf %207, %209 : vector<8x128xf32>
      %211 = arith.mulf %36, %210 : vector<8x128xf32>
      %212 = math.tanh %211 : vector<8x128xf32>
      %213 = arith.mulf %36, %212 : vector<8x128xf32>
      %214 = arith.addf %213, %39 : vector<8x128xf32>
      %215 = vector.extract_strided_slice %214 {offsets = [0, 0], sizes = [8, 32], strides = [1, 1]} : vector<8x128xf32> to vector<8x32xf32>
      %216 = vector.extract_strided_slice %214 {offsets = [0, 32], sizes = [8, 32], strides = [1, 1]} : vector<8x128xf32> to vector<8x32xf32>
      %217 = vector.extract_strided_slice %214 {offsets = [0, 64], sizes = [8, 32], strides = [1, 1]} : vector<8x128xf32> to vector<8x32xf32>
      %218 = vector.extract_strided_slice %214 {offsets = [0, 96], sizes = [8, 32], strides = [1, 1]} : vector<8x128xf32> to vector<8x32xf32>
      %219 = arith.mulf %216, %172 : vector<8x32xf32>
      %220 = arith.mulf %215, %217 : vector<8x32xf32>
      %221 = arith.addf %219, %220 : vector<8x32xf32>
      %222 = math.tanh %221 : vector<8x32xf32>
      %223 = arith.mulf %218, %222 : vector<8x32xf32>
      %224 = arith.select %204, %221, %172 : vector<8x32xi1>, vector<8x32xf32>
      %225 = arith.select %204, %223, %173 : vector<8x32xi1>, vector<8x32xf32>
      %226 = tpu.concatenate %223, %193 in 1 : vector<8x32xf32>, vector<8x32xf32> -> vector<8x64xf32>
      %227 = arith.truncf %226 : vector<8x64xf32> to vector<8x64xbf16>
      %cst_62 = arith.constant dense<0.000000e+00> : vector<8x128xf32>
      %228 = tpu.matmul %227, %25, %cst_62 {dimension_numbers = #tpu.dot_dimension_numbers<[1], [0], [0], [1], [0, 0, 1, 1], [], []>} : vector<8x64xbf16>, vector<64x128xbf16>, vector<8x128xf32> -> vector<8x128xf32>
      %229 = vector.broadcast %26 : vector<1x128xf32> to vector<8x128xf32>
      %230 = arith.addf %228, %229 : vector<8x128xf32>
      %231 = arith.mulf %36, %230 : vector<8x128xf32>
      %232 = math.tanh %231 : vector<8x128xf32>
      %233 = arith.mulf %36, %232 : vector<8x128xf32>
      %234 = arith.addf %233, %39 : vector<8x128xf32>
      %235 = vector.extract_strided_slice %234 {offsets = [0, 0], sizes = [8, 32], strides = [1, 1]} : vector<8x128xf32> to vector<8x32xf32>
      %236 = vector.extract_strided_slice %234 {offsets = [0, 32], sizes = [8, 32], strides = [1, 1]} : vector<8x128xf32> to vector<8x32xf32>
      %237 = vector.extract_strided_slice %234 {offsets = [0, 64], sizes = [8, 32], strides = [1, 1]} : vector<8x128xf32> to vector<8x32xf32>
      %238 = vector.extract_strided_slice %234 {offsets = [0, 96], sizes = [8, 32], strides = [1, 1]} : vector<8x128xf32> to vector<8x32xf32>
      %239 = arith.mulf %236, %192 : vector<8x32xf32>
      %240 = arith.mulf %235, %237 : vector<8x32xf32>
      %241 = arith.addf %239, %240 : vector<8x32xf32>
      %242 = math.tanh %241 : vector<8x32xf32>
      %243 = arith.mulf %238, %242 : vector<8x32xf32>
      %244 = arith.select %204, %241, %192 : vector<8x32xi1>, vector<8x32xf32>
      %245 = arith.select %204, %243, %193 : vector<8x32xi1>, vector<8x32xf32>
      %cst_63 = arith.constant 0.000000e+00 : f32
      %246 = vector.broadcast %cst_63 : f32 to vector<8x32xf32>
      %247 = arith.select %204, %243, %246 : vector<8x32xi1>, vector<8x32xf32>
      %248 = arith.index_cast %c3_i32 : i32 to index
      %c0_64 = arith.constant 0 : index
      %c0_65 = arith.constant 0 : index
      %249 = vector.load %arg9[%248, %c0_64, %c0_65] : memref<8x8x32xf32, #tpu.memory_space<vmem>>, vector<1x8x32xf32>
      %250 = vector.shape_cast %249 : vector<1x8x32xf32> to vector<8x32xf32>
      %251 = vector.shape_cast %247 : vector<8x32xf32> to vector<1x8x32xf32>
      tpu.vector_store %arg9[%248, %c0_64, %c0_65], %251 {strides = array<i32>} : memref<8x8x32xf32, #tpu.memory_space<vmem>>, vector<1x8x32xf32>,
      %c4_i32 = arith.constant 4 : i32
      %252 = arith.addi %3, %c4_i32 : i32
      %253 = vector.broadcast %252 : i32 to vector<8x1xi32>
      %254 = arith.cmpi slt, %253, %27 : vector<8x1xi32>
      %255 = vector.shape_cast %254 : vector<8x1xi1> to vector<8x1xi1>
      %256 = vector.broadcast %255 : vector<8x1xi1> to vector<8x32xi1>
      %257 = arith.index_cast %c4_i32 : i32 to index
      %c0_66 = arith.constant 0 : index
      %c0_67 = arith.constant 0 : index
      %258 = vector.load %arg10[%257, %c0_66, %c0_67] : memref<8x8x128xf32, #tpu.memory_space<vmem>>, vector<1x8x128xf32>
      %259 = vector.shape_cast %258 : vector<1x8x128xf32> to vector<8x128xf32>
      %260 = arith.truncf %225 : vector<8x32xf32> to vector<8x32xbf16>
      %cst_68 = arith.constant dense<0.000000e+00> : vector<8x128xf32>
      %261 = tpu.matmul %260, %24, %cst_68 {dimension_numbers = #tpu.dot_dimension_numbers<[1], [0], [0], [1], [0, 0, 1, 1], [], []>} : vector<8x32xbf16>, vector<32x128xbf16>, vector<8x128xf32> -> vector<8x128xf32>
      %262 = arith.addf %259, %261 : vector<8x128xf32>
      %263 = arith.mulf %36, %262 : vector<8x128xf32>
      %264 = math.tanh %263 : vector<8x128xf32>
      %265 = arith.mulf %36, %264 : vector<8x128xf32>
      %266 = arith.addf %265, %39 : vector<8x128xf32>
      %267 = vector.extract_strided_slice %266 {offsets = [0, 0], sizes = [8, 32], strides = [1, 1]} : vector<8x128xf32> to vector<8x32xf32>
      %268 = vector.extract_strided_slice %266 {offsets = [0, 32], sizes = [8, 32], strides = [1, 1]} : vector<8x128xf32> to vector<8x32xf32>
      %269 = vector.extract_strided_slice %266 {offsets = [0, 64], sizes = [8, 32], strides = [1, 1]} : vector<8x128xf32> to vector<8x32xf32>
      %270 = vector.extract_strided_slice %266 {offsets = [0, 96], sizes = [8, 32], strides = [1, 1]} : vector<8x128xf32> to vector<8x32xf32>
      %271 = arith.mulf %268, %224 : vector<8x32xf32>
      %272 = arith.mulf %267, %269 : vector<8x32xf32>
      %273 = arith.addf %271, %272 : vector<8x32xf32>
      %274 = math.tanh %273 : vector<8x32xf32>
      %275 = arith.mulf %270, %274 : vector<8x32xf32>
      %276 = arith.select %256, %273, %224 : vector<8x32xi1>, vector<8x32xf32>
      %277 = arith.select %256, %275, %225 : vector<8x32xi1>, vector<8x32xf32>
      %278 = tpu.concatenate %275, %245 in 1 : vector<8x32xf32>, vector<8x32xf32> -> vector<8x64xf32>
      %279 = arith.truncf %278 : vector<8x64xf32> to vector<8x64xbf16>
      %cst_69 = arith.constant dense<0.000000e+00> : vector<8x128xf32>
      %280 = tpu.matmul %279, %25, %cst_69 {dimension_numbers = #tpu.dot_dimension_numbers<[1], [0], [0], [1], [0, 0, 1, 1], [], []>} : vector<8x64xbf16>, vector<64x128xbf16>, vector<8x128xf32> -> vector<8x128xf32>
      %281 = vector.broadcast %26 : vector<1x128xf32> to vector<8x128xf32>
      %282 = arith.addf %280, %281 : vector<8x128xf32>
      %283 = arith.mulf %36, %282 : vector<8x128xf32>
      %284 = math.tanh %283 : vector<8x128xf32>
      %285 = arith.mulf %36, %284 : vector<8x128xf32>
      %286 = arith.addf %285, %39 : vector<8x128xf32>
      %287 = vector.extract_strided_slice %286 {offsets = [0, 0], sizes = [8, 32], strides = [1, 1]} : vector<8x128xf32> to vector<8x32xf32>
      %288 = vector.extract_strided_slice %286 {offsets = [0, 32], sizes = [8, 32], strides = [1, 1]} : vector<8x128xf32> to vector<8x32xf32>
      %289 = vector.extract_strided_slice %286 {offsets = [0, 64], sizes = [8, 32], strides = [1, 1]} : vector<8x128xf32> to vector<8x32xf32>
      %290 = vector.extract_strided_slice %286 {offsets = [0, 96], sizes = [8, 32], strides = [1, 1]} : vector<8x128xf32> to vector<8x32xf32>
      %291 = arith.mulf %288, %244 : vector<8x32xf32>
      %292 = arith.mulf %287, %289 : vector<8x32xf32>
      %293 = arith.addf %291, %292 : vector<8x32xf32>
      %294 = math.tanh %293 : vector<8x32xf32>
      %295 = arith.mulf %290, %294 : vector<8x32xf32>
      %296 = arith.select %256, %293, %244 : vector<8x32xi1>, vector<8x32xf32>
      %297 = arith.select %256, %295, %245 : vector<8x32xi1>, vector<8x32xf32>
      %cst_70 = arith.constant 0.000000e+00 : f32
      %298 = vector.broadcast %cst_70 : f32 to vector<8x32xf32>
      %299 = arith.select %256, %295, %298 : vector<8x32xi1>, vector<8x32xf32>
      %300 = arith.index_cast %c4_i32 : i32 to index
      %c0_71 = arith.constant 0 : index
      %c0_72 = arith.constant 0 : index
      %301 = vector.load %arg9[%300, %c0_71, %c0_72] : memref<8x8x32xf32, #tpu.memory_space<vmem>>, vector<1x8x32xf32>
      %302 = vector.shape_cast %301 : vector<1x8x32xf32> to vector<8x32xf32>
      %303 = vector.shape_cast %299 : vector<8x32xf32> to vector<1x8x32xf32>
      tpu.vector_store %arg9[%300, %c0_71, %c0_72], %303 {strides = array<i32>} : memref<8x8x32xf32, #tpu.memory_space<vmem>>, vector<1x8x32xf32>,
      %c5_i32 = arith.constant 5 : i32
      %304 = arith.addi %3, %c5_i32 : i32
      %305 = vector.broadcast %304 : i32 to vector<8x1xi32>
      %306 = arith.cmpi slt, %305, %27 : vector<8x1xi32>
      %307 = vector.shape_cast %306 : vector<8x1xi1> to vector<8x1xi1>
      %308 = vector.broadcast %307 : vector<8x1xi1> to vector<8x32xi1>
      %309 = arith.index_cast %c5_i32 : i32 to index
      %c0_73 = arith.constant 0 : index
      %c0_74 = arith.constant 0 : index
      %310 = vector.load %arg10[%309, %c0_73, %c0_74] : memref<8x8x128xf32, #tpu.memory_space<vmem>>, vector<1x8x128xf32>
      %311 = vector.shape_cast %310 : vector<1x8x128xf32> to vector<8x128xf32>
      %312 = arith.truncf %277 : vector<8x32xf32> to vector<8x32xbf16>
      %cst_75 = arith.constant dense<0.000000e+00> : vector<8x128xf32>
      %313 = tpu.matmul %312, %24, %cst_75 {dimension_numbers = #tpu.dot_dimension_numbers<[1], [0], [0], [1], [0, 0, 1, 1], [], []>} : vector<8x32xbf16>, vector<32x128xbf16>, vector<8x128xf32> -> vector<8x128xf32>
      %314 = arith.addf %311, %313 : vector<8x128xf32>
      %315 = arith.mulf %36, %314 : vector<8x128xf32>
      %316 = math.tanh %315 : vector<8x128xf32>
      %317 = arith.mulf %36, %316 : vector<8x128xf32>
      %318 = arith.addf %317, %39 : vector<8x128xf32>
      %319 = vector.extract_strided_slice %318 {offsets = [0, 0], sizes = [8, 32], strides = [1, 1]} : vector<8x128xf32> to vector<8x32xf32>
      %320 = vector.extract_strided_slice %318 {offsets = [0, 32], sizes = [8, 32], strides = [1, 1]} : vector<8x128xf32> to vector<8x32xf32>
      %321 = vector.extract_strided_slice %318 {offsets = [0, 64], sizes = [8, 32], strides = [1, 1]} : vector<8x128xf32> to vector<8x32xf32>
      %322 = vector.extract_strided_slice %318 {offsets = [0, 96], sizes = [8, 32], strides = [1, 1]} : vector<8x128xf32> to vector<8x32xf32>
      %323 = arith.mulf %320, %276 : vector<8x32xf32>
      %324 = arith.mulf %319, %321 : vector<8x32xf32>
      %325 = arith.addf %323, %324 : vector<8x32xf32>
      %326 = math.tanh %325 : vector<8x32xf32>
      %327 = arith.mulf %322, %326 : vector<8x32xf32>
      %328 = arith.select %308, %325, %276 : vector<8x32xi1>, vector<8x32xf32>
      %329 = arith.select %308, %327, %277 : vector<8x32xi1>, vector<8x32xf32>
      %330 = tpu.concatenate %327, %297 in 1 : vector<8x32xf32>, vector<8x32xf32> -> vector<8x64xf32>
      %331 = arith.truncf %330 : vector<8x64xf32> to vector<8x64xbf16>
      %cst_76 = arith.constant dense<0.000000e+00> : vector<8x128xf32>
      %332 = tpu.matmul %331, %25, %cst_76 {dimension_numbers = #tpu.dot_dimension_numbers<[1], [0], [0], [1], [0, 0, 1, 1], [], []>} : vector<8x64xbf16>, vector<64x128xbf16>, vector<8x128xf32> -> vector<8x128xf32>
      %333 = vector.broadcast %26 : vector<1x128xf32> to vector<8x128xf32>
      %334 = arith.addf %332, %333 : vector<8x128xf32>
      %335 = arith.mulf %36, %334 : vector<8x128xf32>
      %336 = math.tanh %335 : vector<8x128xf32>
      %337 = arith.mulf %36, %336 : vector<8x128xf32>
      %338 = arith.addf %337, %39 : vector<8x128xf32>
      %339 = vector.extract_strided_slice %338 {offsets = [0, 0], sizes = [8, 32], strides = [1, 1]} : vector<8x128xf32> to vector<8x32xf32>
      %340 = vector.extract_strided_slice %338 {offsets = [0, 32], sizes = [8, 32], strides = [1, 1]} : vector<8x128xf32> to vector<8x32xf32>
      %341 = vector.extract_strided_slice %338 {offsets = [0, 64], sizes = [8, 32], strides = [1, 1]} : vector<8x128xf32> to vector<8x32xf32>
      %342 = vector.extract_strided_slice %338 {offsets = [0, 96], sizes = [8, 32], strides = [1, 1]} : vector<8x128xf32> to vector<8x32xf32>
      %343 = arith.mulf %340, %296 : vector<8x32xf32>
      %344 = arith.mulf %339, %341 : vector<8x32xf32>
      %345 = arith.addf %343, %344 : vector<8x32xf32>
      %346 = math.tanh %345 : vector<8x32xf32>
      %347 = arith.mulf %342, %346 : vector<8x32xf32>
      %348 = arith.select %308, %345, %296 : vector<8x32xi1>, vector<8x32xf32>
      %349 = arith.select %308, %347, %297 : vector<8x32xi1>, vector<8x32xf32>
      %cst_77 = arith.constant 0.000000e+00 : f32
      %350 = vector.broadcast %cst_77 : f32 to vector<8x32xf32>
      %351 = arith.select %308, %347, %350 : vector<8x32xi1>, vector<8x32xf32>
      %352 = arith.index_cast %c5_i32 : i32 to index
      %c0_78 = arith.constant 0 : index
      %c0_79 = arith.constant 0 : index
      %353 = vector.load %arg9[%352, %c0_78, %c0_79] : memref<8x8x32xf32, #tpu.memory_space<vmem>>, vector<1x8x32xf32>
      %354 = vector.shape_cast %353 : vector<1x8x32xf32> to vector<8x32xf32>
      %355 = vector.shape_cast %351 : vector<8x32xf32> to vector<1x8x32xf32>
      tpu.vector_store %arg9[%352, %c0_78, %c0_79], %355 {strides = array<i32>} : memref<8x8x32xf32, #tpu.memory_space<vmem>>, vector<1x8x32xf32>,
      %c6_i32 = arith.constant 6 : i32
      %356 = arith.addi %3, %c6_i32 : i32
      %357 = vector.broadcast %356 : i32 to vector<8x1xi32>
      %358 = arith.cmpi slt, %357, %27 : vector<8x1xi32>
      %359 = vector.shape_cast %358 : vector<8x1xi1> to vector<8x1xi1>
      %360 = vector.broadcast %359 : vector<8x1xi1> to vector<8x32xi1>
      %361 = arith.index_cast %c6_i32 : i32 to index
      %c0_80 = arith.constant 0 : index
      %c0_81 = arith.constant 0 : index
      %362 = vector.load %arg10[%361, %c0_80, %c0_81] : memref<8x8x128xf32, #tpu.memory_space<vmem>>, vector<1x8x128xf32>
      %363 = vector.shape_cast %362 : vector<1x8x128xf32> to vector<8x128xf32>
      %364 = arith.truncf %329 : vector<8x32xf32> to vector<8x32xbf16>
      %cst_82 = arith.constant dense<0.000000e+00> : vector<8x128xf32>
      %365 = tpu.matmul %364, %24, %cst_82 {dimension_numbers = #tpu.dot_dimension_numbers<[1], [0], [0], [1], [0, 0, 1, 1], [], []>} : vector<8x32xbf16>, vector<32x128xbf16>, vector<8x128xf32> -> vector<8x128xf32>
      %366 = arith.addf %363, %365 : vector<8x128xf32>
      %367 = arith.mulf %36, %366 : vector<8x128xf32>
      %368 = math.tanh %367 : vector<8x128xf32>
      %369 = arith.mulf %36, %368 : vector<8x128xf32>
      %370 = arith.addf %369, %39 : vector<8x128xf32>
      %371 = vector.extract_strided_slice %370 {offsets = [0, 0], sizes = [8, 32], strides = [1, 1]} : vector<8x128xf32> to vector<8x32xf32>
      %372 = vector.extract_strided_slice %370 {offsets = [0, 32], sizes = [8, 32], strides = [1, 1]} : vector<8x128xf32> to vector<8x32xf32>
      %373 = vector.extract_strided_slice %370 {offsets = [0, 64], sizes = [8, 32], strides = [1, 1]} : vector<8x128xf32> to vector<8x32xf32>
      %374 = vector.extract_strided_slice %370 {offsets = [0, 96], sizes = [8, 32], strides = [1, 1]} : vector<8x128xf32> to vector<8x32xf32>
      %375 = arith.mulf %372, %328 : vector<8x32xf32>
      %376 = arith.mulf %371, %373 : vector<8x32xf32>
      %377 = arith.addf %375, %376 : vector<8x32xf32>
      %378 = math.tanh %377 : vector<8x32xf32>
      %379 = arith.mulf %374, %378 : vector<8x32xf32>
      %380 = arith.select %360, %377, %328 : vector<8x32xi1>, vector<8x32xf32>
      %381 = arith.select %360, %379, %329 : vector<8x32xi1>, vector<8x32xf32>
      %382 = tpu.concatenate %379, %349 in 1 : vector<8x32xf32>, vector<8x32xf32> -> vector<8x64xf32>
      %383 = arith.truncf %382 : vector<8x64xf32> to vector<8x64xbf16>
      %cst_83 = arith.constant dense<0.000000e+00> : vector<8x128xf32>
      %384 = tpu.matmul %383, %25, %cst_83 {dimension_numbers = #tpu.dot_dimension_numbers<[1], [0], [0], [1], [0, 0, 1, 1], [], []>} : vector<8x64xbf16>, vector<64x128xbf16>, vector<8x128xf32> -> vector<8x128xf32>
      %385 = vector.broadcast %26 : vector<1x128xf32> to vector<8x128xf32>
      %386 = arith.addf %384, %385 : vector<8x128xf32>
      %387 = arith.mulf %36, %386 : vector<8x128xf32>
      %388 = math.tanh %387 : vector<8x128xf32>
      %389 = arith.mulf %36, %388 : vector<8x128xf32>
      %390 = arith.addf %389, %39 : vector<8x128xf32>
      %391 = vector.extract_strided_slice %390 {offsets = [0, 0], sizes = [8, 32], strides = [1, 1]} : vector<8x128xf32> to vector<8x32xf32>
      %392 = vector.extract_strided_slice %390 {offsets = [0, 32], sizes = [8, 32], strides = [1, 1]} : vector<8x128xf32> to vector<8x32xf32>
      %393 = vector.extract_strided_slice %390 {offsets = [0, 64], sizes = [8, 32], strides = [1, 1]} : vector<8x128xf32> to vector<8x32xf32>
      %394 = vector.extract_strided_slice %390 {offsets = [0, 96], sizes = [8, 32], strides = [1, 1]} : vector<8x128xf32> to vector<8x32xf32>
      %395 = arith.mulf %392, %348 : vector<8x32xf32>
      %396 = arith.mulf %391, %393 : vector<8x32xf32>
      %397 = arith.addf %395, %396 : vector<8x32xf32>
      %398 = math.tanh %397 : vector<8x32xf32>
      %399 = arith.mulf %394, %398 : vector<8x32xf32>
      %400 = arith.select %360, %397, %348 : vector<8x32xi1>, vector<8x32xf32>
      %401 = arith.select %360, %399, %349 : vector<8x32xi1>, vector<8x32xf32>
      %cst_84 = arith.constant 0.000000e+00 : f32
      %402 = vector.broadcast %cst_84 : f32 to vector<8x32xf32>
      %403 = arith.select %360, %399, %402 : vector<8x32xi1>, vector<8x32xf32>
      %404 = arith.index_cast %c6_i32 : i32 to index
      %c0_85 = arith.constant 0 : index
      %c0_86 = arith.constant 0 : index
      %405 = vector.load %arg9[%404, %c0_85, %c0_86] : memref<8x8x32xf32, #tpu.memory_space<vmem>>, vector<1x8x32xf32>
      %406 = vector.shape_cast %405 : vector<1x8x32xf32> to vector<8x32xf32>
      %407 = vector.shape_cast %403 : vector<8x32xf32> to vector<1x8x32xf32>
      tpu.vector_store %arg9[%404, %c0_85, %c0_86], %407 {strides = array<i32>} : memref<8x8x32xf32, #tpu.memory_space<vmem>>, vector<1x8x32xf32>,
      %c7_i32 = arith.constant 7 : i32
      %408 = arith.addi %3, %c7_i32 : i32
      %409 = vector.broadcast %408 : i32 to vector<8x1xi32>
      %410 = arith.cmpi slt, %409, %27 : vector<8x1xi32>
      %411 = vector.shape_cast %410 : vector<8x1xi1> to vector<8x1xi1>
      %412 = vector.broadcast %411 : vector<8x1xi1> to vector<8x32xi1>
      %413 = arith.index_cast %c7_i32 : i32 to index
      %c0_87 = arith.constant 0 : index
      %c0_88 = arith.constant 0 : index
      %414 = vector.load %arg10[%413, %c0_87, %c0_88] : memref<8x8x128xf32, #tpu.memory_space<vmem>>, vector<1x8x128xf32>
      %415 = vector.shape_cast %414 : vector<1x8x128xf32> to vector<8x128xf32>
      %416 = arith.truncf %381 : vector<8x32xf32> to vector<8x32xbf16>
      %cst_89 = arith.constant dense<0.000000e+00> : vector<8x128xf32>
      %417 = tpu.matmul %416, %24, %cst_89 {dimension_numbers = #tpu.dot_dimension_numbers<[1], [0], [0], [1], [0, 0, 1, 1], [], []>} : vector<8x32xbf16>, vector<32x128xbf16>, vector<8x128xf32> -> vector<8x128xf32>
      %418 = arith.addf %415, %417 : vector<8x128xf32>
      %419 = arith.mulf %36, %418 : vector<8x128xf32>
      %420 = math.tanh %419 : vector<8x128xf32>
      %421 = arith.mulf %36, %420 : vector<8x128xf32>
      %422 = arith.addf %421, %39 : vector<8x128xf32>
      %423 = vector.extract_strided_slice %422 {offsets = [0, 0], sizes = [8, 32], strides = [1, 1]} : vector<8x128xf32> to vector<8x32xf32>
      %424 = vector.extract_strided_slice %422 {offsets = [0, 32], sizes = [8, 32], strides = [1, 1]} : vector<8x128xf32> to vector<8x32xf32>
      %425 = vector.extract_strided_slice %422 {offsets = [0, 64], sizes = [8, 32], strides = [1, 1]} : vector<8x128xf32> to vector<8x32xf32>
      %426 = vector.extract_strided_slice %422 {offsets = [0, 96], sizes = [8, 32], strides = [1, 1]} : vector<8x128xf32> to vector<8x32xf32>
      %427 = arith.mulf %424, %380 : vector<8x32xf32>
      %428 = arith.mulf %423, %425 : vector<8x32xf32>
      %429 = arith.addf %427, %428 : vector<8x32xf32>
      %430 = math.tanh %429 : vector<8x32xf32>
      %431 = arith.mulf %426, %430 : vector<8x32xf32>
      %432 = arith.select %412, %429, %380 : vector<8x32xi1>, vector<8x32xf32>
      %433 = arith.select %412, %431, %381 : vector<8x32xi1>, vector<8x32xf32>
      %434 = tpu.concatenate %431, %401 in 1 : vector<8x32xf32>, vector<8x32xf32> -> vector<8x64xf32>
      %435 = arith.truncf %434 : vector<8x64xf32> to vector<8x64xbf16>
      %cst_90 = arith.constant dense<0.000000e+00> : vector<8x128xf32>
      %436 = tpu.matmul %435, %25, %cst_90 {dimension_numbers = #tpu.dot_dimension_numbers<[1], [0], [0], [1], [0, 0, 1, 1], [], []>} : vector<8x64xbf16>, vector<64x128xbf16>, vector<8x128xf32> -> vector<8x128xf32>
      %437 = vector.broadcast %26 : vector<1x128xf32> to vector<8x128xf32>
      %438 = arith.addf %436, %437 : vector<8x128xf32>
      %439 = arith.mulf %36, %438 : vector<8x128xf32>
      %440 = math.tanh %439 : vector<8x128xf32>
      %441 = arith.mulf %36, %440 : vector<8x128xf32>
      %442 = arith.addf %441, %39 : vector<8x128xf32>
      %443 = vector.extract_strided_slice %442 {offsets = [0, 0], sizes = [8, 32], strides = [1, 1]} : vector<8x128xf32> to vector<8x32xf32>
      %444 = vector.extract_strided_slice %442 {offsets = [0, 32], sizes = [8, 32], strides = [1, 1]} : vector<8x128xf32> to vector<8x32xf32>
      %445 = vector.extract_strided_slice %442 {offsets = [0, 64], sizes = [8, 32], strides = [1, 1]} : vector<8x128xf32> to vector<8x32xf32>
      %446 = vector.extract_strided_slice %442 {offsets = [0, 96], sizes = [8, 32], strides = [1, 1]} : vector<8x128xf32> to vector<8x32xf32>
      %447 = arith.mulf %444, %400 : vector<8x32xf32>
      %448 = arith.mulf %443, %445 : vector<8x32xf32>
      %449 = arith.addf %447, %448 : vector<8x32xf32>
      %450 = math.tanh %449 : vector<8x32xf32>
      %451 = arith.mulf %446, %450 : vector<8x32xf32>
      %452 = arith.select %412, %449, %400 : vector<8x32xi1>, vector<8x32xf32>
      %453 = arith.select %412, %451, %401 : vector<8x32xi1>, vector<8x32xf32>
      %cst_91 = arith.constant 0.000000e+00 : f32
      %454 = vector.broadcast %cst_91 : f32 to vector<8x32xf32>
      %455 = arith.select %412, %451, %454 : vector<8x32xi1>, vector<8x32xf32>
      %456 = arith.index_cast %c7_i32 : i32 to index
      %c0_92 = arith.constant 0 : index
      %c0_93 = arith.constant 0 : index
      %457 = vector.load %arg9[%456, %c0_92, %c0_93] : memref<8x8x32xf32, #tpu.memory_space<vmem>>, vector<1x8x32xf32>
      %458 = vector.shape_cast %457 : vector<1x8x32xf32> to vector<8x32xf32>
      %459 = vector.shape_cast %455 : vector<8x32xf32> to vector<1x8x32xf32>
      tpu.vector_store %arg9[%456, %c0_92, %c0_93], %459 {strides = array<i32>} : memref<8x8x32xf32, #tpu.memory_space<vmem>>, vector<1x8x32xf32>,
      %c8_i32_94 = arith.constant 8 : i32
      %c0_95 = arith.constant 0 : index
      %c0_96 = arith.constant 0 : index
      %460 = vector.load %arg11[%c0_95, %c0_96] : memref<8x32xf32, #tpu.memory_space<vmem>>, vector<8x32xf32>
      tpu.vector_store %arg11[%c0_95, %c0_96], %433 {strides = array<i32>} : memref<8x32xf32, #tpu.memory_space<vmem>>, vector<8x32xf32>,
      %c0_97 = arith.constant 0 : index
      %c0_98 = arith.constant 0 : index
      %461 = vector.load %arg12[%c0_97, %c0_98] : memref<8x32xf32, #tpu.memory_space<vmem>>, vector<8x32xf32>
      tpu.vector_store %arg12[%c0_97, %c0_98], %432 {strides = array<i32>} : memref<8x32xf32, #tpu.memory_space<vmem>>, vector<8x32xf32>,
      %c0_99 = arith.constant 0 : index
      %c0_100 = arith.constant 0 : index
      %462 = vector.load %arg13[%c0_99, %c0_100] : memref<8x32xf32, #tpu.memory_space<vmem>>, vector<8x32xf32>
      tpu.vector_store %arg13[%c0_99, %c0_100], %453 {strides = array<i32>} : memref<8x32xf32, #tpu.memory_space<vmem>>, vector<8x32xf32>,
      %c0_101 = arith.constant 0 : index
      %c0_102 = arith.constant 0 : index
      %463 = vector.load %arg14[%c0_101, %c0_102] : memref<8x32xf32, #tpu.memory_space<vmem>>, vector<8x32xf32>
      tpu.vector_store %arg14[%c0_101, %c0_102], %452 {strides = array<i32>} : memref<8x32xf32, #tpu.memory_space<vmem>>, vector<8x32xf32>,
    } else {
    }
    return
  }
  func.func @transform_0(%arg0: i32, %arg1: memref<1xi32, #tpu.memory_space<smem>>) -> (i32, i32) {
    %c0_i32 = arith.constant 0 : i32
    %c0_i32_0 = arith.constant 0 : i32
    %c0_i32_1 = arith.constant 0 : i32
    return %c0_i32, %c0_i32_0 : i32, i32
  }
  func.func @transform_1(%arg0: i32, %arg1: memref<1xi32, #tpu.memory_space<smem>>) -> (i32, i32, i32) {
    %c0_i32 = arith.constant 0 : i32
    %c0_i32_0 = arith.constant 0 : i32
    %c0_i32_1 = arith.constant 0 : i32
    return %arg0, %c0_i32, %c0_i32_0 : i32, i32, i32
  }
  func.func @transform_2(%arg0: i32, %arg1: memref<1xi32, #tpu.memory_space<smem>>) -> (i32, i32) {
    %c0_i32 = arith.constant 0 : i32
    %c0_i32_0 = arith.constant 0 : i32
    %c0_i32_1 = arith.constant 0 : i32
    return %c0_i32, %c0_i32_0 : i32, i32
  }
  func.func @transform_3(%arg0: i32, %arg1: memref<1xi32, #tpu.memory_space<smem>>) -> (i32, i32) {
    %c0_i32 = arith.constant 0 : i32
    %c0_i32_0 = arith.constant 0 : i32
    %c0_i32_1 = arith.constant 0 : i32
    return %c0_i32, %c0_i32_0 : i32, i32
  }
  func.func @transform_4(%arg0: i32, %arg1: memref<1xi32, #tpu.memory_space<smem>>) -> (i32, i32) {
    %c0_i32 = arith.constant 0 : i32
    %c0_i32_0 = arith.constant 0 : i32
    %c0_i32_1 = arith.constant 0 : i32
    return %c0_i32, %c0_i32_0 : i32, i32
  }
  func.func @transform_5(%arg0: i32, %arg1: memref<1xi32, #tpu.memory_space<smem>>) -> (i32, i32) {
    %c0_i32 = arith.constant 0 : i32
    %c0_i32_0 = arith.constant 0 : i32
    %c0_i32_1 = arith.constant 0 : i32
    return %c0_i32, %c0_i32_0 : i32, i32
  }
  func.func @transform_6(%arg0: i32, %arg1: memref<1xi32, #tpu.memory_space<smem>>) -> (i32, i32) {
    %c0_i32 = arith.constant 0 : i32
    %c0_i32_0 = arith.constant 0 : i32
    %c0_i32_1 = arith.constant 0 : i32
    return %c0_i32, %c0_i32_0 : i32, i32
  }
  func.func @transform_7(%arg0: i32, %arg1: memref<1xi32, #tpu.memory_space<smem>>) -> (i32, i32, i32) {
    %c0_i32 = arith.constant 0 : i32
    %c0_i32_0 = arith.constant 0 : i32
    %c0_i32_1 = arith.constant 0 : i32
    return %arg0, %c0_i32, %c0_i32_0 : i32, i32, i32
  }
}

</mosaic_0001>

<bundles_post_ra>
// kernel: tpu_custom_call.1
= control target key start
LH: loop header
LB: loop body
LE: loop exit
PB: predicated region body
PF: predicated region fallthrough
CT: control target
= control target key end

     0   :  { %14 = vsyncpa [#allocation10], 0  ;;  %s2927_s0 = inlined_call_operand.<no memory space> [shape: s32[1], index: 0, kind: input, shape index: {}]   ;;  %s2928_s1 = inlined_call_operand.vmem [shape: s32[8,1], index: 1, kind: input, shape index: {}]   ;;  %s2929_s2 = inlined_call_operand.hbm [shape: f32[8,8,16], index: 2, kind: input, shape index: {}]   ;;  %s2930_s3 = inlined_call_operand.vmem [shape: bf16[16,128], index: 3, kind: input, shape index: {}]   ;;  %s2931_s4 = inlined_call_operand.vmem [shape: bf16[32,128], index: 4, kind: input, shape index: {}]   ;;  %s2932_s5 = inlined_call_operand.vmem [shape: f32[1,128], index: 5, kind: input, shape index: {}]   ;;  %s2933_s6 = inlined_call_operand.hbm [shape: bf16[64,128], index: 6, kind: input, shape index: {}]   ;;  %s2934_s7 = inlined_call_operand.vmem [shape: f32[1,128], index: 7, kind: input, shape index: {}]   ;;  %s2935_s8 = inlined_call_operand.hbm [shape: f32[8,8,32], index: 8, kind: output, shape index: {}]  }
   0x1   :  { %15 = vsyncpa [#allocation13], 0 }
   0x2   :  { %16 = vsyncpa [#allocation11], 0  ;;  %s2091_s27 = smov [#allocation9]   ;;  %s2019_s9 = scalar_lea.hbm %s2929_s2, 1024 }
   0x3   :  { %s24_s28 = sshll.u32 %s2091_s27, 4  ;;  %p2020_p0 = scmp.ne.s32.totalorder %s2929_s2, %s2019_s9  ;;  %s25_s28 = int_to_ptr.vmem [resolvable:$true] %s24_s28 }
   0x4   :  { %p2023_p1 = scmp.lt.u32.totalorder %s2019_s9, %s2929_s2 }
   0x6   :  { %p2025_p2 = pnand %p2023_p1, %p2020_p0 }
   0x8   :  { %2028 = shalt.err (!%p2025_p2)
}
   0x9   :  { %s2029_s14 = scalar_lea.vmem %s25_s28, 1024  ;;  %p2034_p4 = scmp.lt.s32.totalorder %s25_s28, %s25_s28 }
   0xa   :  { %p2030_p3 = scmp.ne.s32.totalorder %s25_s28, %s2029_s14  ;;  %p2035_p5 = scmp.lt.s32.totalorder %s2029_s14, %s2029_s14 }
   0xc   :  { %p2036_p6 = por %p2035_p5, %p2034_p4 }
   0xe   :  { %p2037_p7 = pnand %p2036_p6, %p2030_p3 }
  0x10   :  { %2040 = shalt.err (!%p2037_p7)
}
  0x11   :  { %s2092_s15 = smov 128   ;;  %s2093_s16 = smov 8  }
  0x12   :  { %30 = dma.hbm_to_vmem [thread:$0]  %s2929_s2, 1024, %s25_s28, [#allocation10], %s2092_s15, %s2092_s15, %s2093_s16  }
  0x13   :  { %s2094_s19 = smov [#allocation12]   ;;  %s2041_s23 = scalar_lea.hbm %s2933_s6, 512 }
  0x14   :  { %s42_s20 = sshll.u32 %s2094_s19, 4  ;;  %p2042_p8 = scmp.ne.s32.totalorder %s2933_s6, %s2041_s23  ;;  %s43_s20 = int_to_ptr.vmem [resolvable:$true] %s42_s20 }
  0x15   :  { %p2045_p9 = scmp.lt.u32.totalorder %s2041_s23, %s2933_s6 }
  0x17   :  { %p2047_p10 = pnand %p2045_p9, %p2042_p8 }
  0x19   :  { %2050 = shalt.err (!%p2047_p10)
}
  0x1a   :  { %s2051_s29 = scalar_lea.vmem %s43_s20, 512  ;;  %p2056_p12 = scmp.lt.s32.totalorder %s43_s20, %s43_s20 }
  0x1b   :  { %p2052_p11 = scmp.ne.s32.totalorder %s43_s20, %s2051_s29  ;;  %p2057_p13 = scmp.lt.s32.totalorder %s2051_s29, %s2051_s29 }
  0x1d   :  { %p2058_p0 = por %p2057_p13, %p2056_p12 }
  0x1f   :  { %p2059_p1 = pnand %p2058_p0, %p2052_p11 }
  0x21   :  { %2062 = shalt.err (!%p2059_p1)
}
  0x22   :  { %s2095_s2 = smov 64   ;;  %s2096_s28 = smov 4  }
  0x23   :  { %48 = dma.hbm_to_vmem [thread:$0]  %s2933_s6, 512, %s43_s20, [#allocation13], %s2095_s2, %s2095_s2, %s2096_s28  }
  0x24   :  { %2085 = dma.done.wait [#allocation10], 1024  }
  0x25   :  { %2086 = vsyncadd [#allocation10], 4294966272 }
  0x26   :  { %2087 = dma.done.wait [#allocation13], 512  }
  0x27   :  { %2088 = vsyncadd [#allocation13], 4294966784  ;;  %vm62_vm0 = vcmask 261120   ;;  %p70_p2 = scmp.gt.s32.totalorder %s2927_s0, 0  ;;  %p1632_p3 = scmp.lt.s32.totalorder %s2927_s0, 8  ;;  %v2097_v0 = vmov 0.0  }
  0x28   :  { %63 = vst.msk [vmem:[#allocation3] sm:$0xff] %vm62_vm0, %v2097_v0  ;;  %64 = vst.msk [vmem:[#allocation4] sm:$0xff] %vm62_vm0, %v2097_v0 }
  0x29   :  { %65 = vst.msk [vmem:[#allocation5] sm:$0xff] %vm62_vm0, %v2097_v0  ;;  %66 = vst.msk [vmem:[#allocation6] sm:$0xff] %vm62_vm0, %v2097_v0  ;;  %s2937_s0 = smov (!%p70_p2, %s2927_s0), 0 }
  0x2a   :  { %s2939_s0 = smov (!%p1632_p3, %s2937_s0), 8 }
  0x2b   :  { %p1637_p4 = scmp.gt.s32.totalorder %s2939_s0, 0 }
  0x2c   :  { %v2098_v1 = vmov (!%p1637_p4), 0.0  }
  0x2d   :  { %77 = sbr.rel (%p1637_p4) target bundleno = 52 (0x34), region = 45  ;;  %79 = vst.msk [vmem:[#allocation14] sm:$0xff] (!%p1637_p4), %vm62_vm0, %v2098_v1  ;;  %80 = vst.msk [vmem:[#allocation14 + $0x8] sm:$0xff] (!%p1637_p4), %vm62_vm0, %v2098_v1 }
  0x2e   :  { %81 = vst.msk [vmem:[#allocation14 + $0x10] sm:$0xff] (!%p1637_p4), %vm62_vm0, %v2098_v1  ;;  %82 = vst.msk [vmem:[#allocation14 + $0x18] sm:$0xff] (!%p1637_p4), %vm62_vm0, %v2098_v1 }
  0x2f   :  { %83 = vst.msk [vmem:[#allocation14 + $0x20] sm:$0xff] (!%p1637_p4), %vm62_vm0, %v2098_v1  ;;  %84 = vst.msk [vmem:[#allocation14 + $0x28] sm:$0xff] (!%p1637_p4), %vm62_vm0, %v2098_v1 }
  0x30   :  { %85 = vst.msk [vmem:[#allocation14 + $0x30] sm:$0xff] (!%p1637_p4), %vm62_vm0, %v2098_v1  ;;  %86 = vst.msk [vmem:[#allocation14 + $0x38] sm:$0xff] (!%p1637_p4), %vm62_vm0, %v2098_v1 }
  0x34 PF:  { %p1638_p5 = scmp.le.s32.totalorder %s2939_s0, 0 }
  0x35   :  { %v1940_v2 = vld [vmem:[%s2930_s3] sm:$0xff] (!%p1638_p5)   ;;  %v2099_v3 = vmov (!%p1638_p5), 0.0   ;;  %v92_v6 = vld [vmem:[#allocation9 + $0x8] sm:$0xff] (!%p1638_p5)  ;;  %vm118_vm1 = vcmask (!%p1638_p5), 130048   ;;  %v93_v7 = vld [vmem:[#allocation9 + $0x10] sm:$0xff] (!%p1638_p5)  ;;  %vm2100_vm2 = vmmov (!%p1638_p5), 0   ;;  %v218_v15 = vlaneseq (!%p1638_p5) }
  0x36   :  { %90 = sbr.rel (%p1638_p5) target bundleno = 6482 (0x1952), region = 49  ;;  %1757 = vmatprep.subr.bf16.mxu1 (!%p1638_p5), %v2099_v3  ;;  %v2207_v4 = vld [vmem:[%s2931_s4] sm:$0xff] (!%p1638_p5)   ;;  %1747 = vmatprep.subr.bf16.mxu0 (!%p1638_p5), %v1940_v2  ;;  %v94_v9 = vld [vmem:[#allocation9 + $0x18] sm:$0xff] (!%p1638_p5)  ;;  %v2214_v11 = vld [vmem:[%s2931_s4 + $0x8] sm:$0xff] (!%p1638_p5)   ;;  %v2101_v14 = vmov (!%p1638_p5), 0   ;;  %v2102_v23 = vmov (!%p1638_p5), 0.5  }
  0x37   :  { %v91_v5 = vld [vmem:[#allocation9] sm:$0xff] (!%p1638_p5)  ;;  %1758 = vmatpush3.bf16.msra.mxu1 (!%p1638_p5), %v2207_v4  ;;  %1748 = vmatpush3.bf16.msra.mxu0 (!%p1638_p5), %v1940_v2  ;;  %v100_v10 = vpack.c.bf16 (!%p1638_p5), %v94_v9, %v93_v7  ;;  %v219_v16 = vand.u32 (!%p1638_p5), 127, %v218_v15  ;;  %s2103_s25 = smov (!%p1638_p5), 64   ;;  %v226_v36 = vld [vmem:[#allocation4] sm:$0xff] (!%p1638_p5)  ;;  %s2104_s26 = smov (!%p1638_p5), 32   ;;  %v97_v48 = vld [vmem:[#allocation9 + $0x30] sm:$0xff] (!%p1638_p5) }
  0x38   :  { %v99_v8 = vpack.c.bf16 (!%p1638_p5), %v92_v6, %v91_v5  ;;  %1759 = vmatprep.subr.bf16.mxu1 (!%p1638_p5), %v2099_v3  ;;  %1761 = vmatprep.mubr.msk.bf16.mxu1 (!%p1638_p5), %vm2100_vm2, %v2099_v3  ;;  %v2218_v12 = vld [vmem:[#allocation3] sm:$0xff] (!%p1638_p5)  ;;  %v96_v46 = vld [vmem:[#allocation9 + $0x28] sm:$0xff] (!%p1638_p5)  ;;  %v98_v49 = vld [vmem:[#allocation9 + $0x38] sm:$0xff] (!%p1638_p5)  ;;  %s2105_s27 = smov (!%p1638_p5), 96   ;;  %vm366_vm8 = vcmask (!%p1638_p5), 523264  }
  0x39   :  { %1765 = vmatprep.subr.bf16.mxu0 (!%p1638_p5), %v2099_v3  ;;  %v237_v13 = vpack.c.bf16 (!%p1638_p5), %v2218_v12, %v2218_v12  ;;  %1933 = vset.pattern.permute.xlu0 (!%p1638_p5), %v2101_v14  ;;  %vm220_vm3 = vcmp.ge.s32.totalorder (!%p1638_p5), %v219_v16, 64  ;;  %vm221_vm4 = vcmp.lt.s32.totalorder (!%p1638_p5), %v219_v16, 96  ;;  %v2235_v17 = vld [vmem:[%s2932_s5] ss:$0 sm:$0xff] (!%p1638_p5)  ;;  %v2270_v50 = vld [vmem:[#allocation12 + $0x8] sm:$0xff] (!%p1638_p5)   ;;  %v102_v51 = vpack.c.bf16 (!%p1638_p5), %v98_v49, %v97_v48  ;;  %v2281_v53 = vld [vmem:[#allocation12 + $0x10] sm:$0xff] (!%p1638_p5)  }
  0x3a   :  { %1749 = vmatprep.mubr.msk.bf16.mxu0 (!%p1638_p5), %vm118_vm1, %v99_v8  ;;  %1939 = vset.pattern.permute.xlu1 (!%p1638_p5), %v2101_v14  ;;  %vm222_vm5 = vmand (!%p1638_p5), %vm220_vm3, %vm221_vm4  ;;  %v2254_v35 = vld [vmem:[%s2928_s1] sm:$0xff] (!%p1638_p5)  ;;  %v2292_v54 = vld [vmem:[#allocation12 + $0x18] sm:$0xff] (!%p1638_p5)  }
  0x3b   :  { %1750 = vmatmul.mubr.msk.bf16.vlgmr.msra.gmra.mrb[0].mxu0 (!%p1638_p5), %vm118_vm1, %v100_v10  ;;  %1760 = vmatpush3.bf16.msra.mxu1 (!%p1638_p5), %v2214_v11  ;;  %v2244_v24 = vsel (!%p1638_p5), %vm222_vm5, 1.0, %v2102_v23  ;;  %v2247_v32 = vsel (!%p1638_p5), %vm222_vm5, 0.0, %v2102_v23  ;;  %vm1645_vm6 = vcmp.gt.s32.totalorder (!%p1638_p5), %v2254_v35, 0  ;;  %v2267_v44 = vld [vmem:[#allocation12] sm:$0xff] (!%p1638_p5)   ;;  %v2298_v55 = vld [vmem:[#allocation5] sm:$0xff] (!%p1638_p5)  ;;  %vm1655_vm9 = vcmp.gt.s32.totalorder (!%p1638_p5), %v2254_v35, 1 }
  0x3c   :  { %1785 = vmatprep.subr.bf16.mxu1 (!%p1638_p5), %v2099_v3  ;;  %v231_v37 = vsel (!%p1638_p5), %vm1645_vm6, 1, %v2101_v14  ;;  %v95_v45 = vld [vmem:[#allocation9 + $0x20] sm:$0xff] (!%p1638_p5)  ;;  %1766 = vmatpush3.bf16.msra.mxu0 (!%p1638_p5), %v2267_v44  ;;  %vm1658_vm11 = vcmp.gt.s32.totalorder (!%p1638_p5), %v2254_v35, 2  ;;  %vm1661_vm13 = vcmp.gt.s32.totalorder (!%p1638_p5), %v2254_v35, 3  ;;  %vm1664_vm15 = vcmp.gt.s32.totalorder (!%p1638_p5), %v2254_v35, 4 }
  0x3d   :  { %v101_v47 = vpack.c.bf16 %v96_v46, %v95_v45  ;;  %1767 = vmatprep.subr.bf16.mxu0 %v2099_v3  ;;  %v449_v45 = vsel %vm1655_vm9, 1, %v2101_v14  ;;  %vm1667_vm3 = vcmp.gt.s32.totalorder %v2254_v35, 5  ;;  %vm1670_vm5 = vcmp.gt.s32.totalorder %v2254_v35, 6 }
  0x3e   :  { %1762 = vmatmul.mubr.msk.bf16.vlgmr.msra.gmra.mrb[0].mxu1 %vm62_vm0, %v237_v13 }
  0x3f   :  { %1793 = vmatprep.mubr.msk.bf16.mxu1 %vm2100_vm2, %v2099_v3  ;;  %1786 = vmatpush3.bf16.msra.mxu1 %v2267_v44 }
  0x40   :  { %1753 = vmatprep.mubr.msk.bf16.mxu0 %vm118_vm1, %v101_v47  ;;  %1787 = vmatprep.subr.bf16.mxu1 %v2099_v3 }
  0x41   :  { %1768 = vmatpush3.bf16.msra.mxu0 %v2270_v50 }
  0x42   :  { %1769 = vmatprep.subr.bf16.mxu0 %v2099_v3 }
  0x43   :  { %1754 = vmatmul.mubr.msk.bf16.gmra.mrb[4].mxu0 %vm118_vm1, %v102_v51  ;;  %1788 = vmatpush3.bf16.msra.mxu1 %v2270_v50 }
  0x44   :  { %1773 = vmatprep.mubr.msk.bf16.mxu0 %vm2100_vm2, %v2099_v3  ;;  %1789 = vmatprep.subr.bf16.mxu1 %v2099_v3 }
  0x45   :  { %1770 = vmatpush3.bf16.msra.mxu0 %v2281_v53 }
  0x46   :  { %1771 = vmatprep.subr.bf16.mxu0 %v2099_v3 }
  0x47   :  { %1790 = vmatpush3.bf16.msra.mxu1 %v2281_v53 }
  0x48   :  { %1791 = vmatprep.subr.bf16.mxu1 %v2099_v3 }
  0x49   :  { %1772 = vmatpush3.bf16.msra.mxu0 %v2292_v54 }
  0x4a   :  { %1777 = vmatprep.subr.bf16.mxu0 %v2099_v3 }
  0x4b   :  { %1792 = vmatpush3.bf16.msra.mxu1 %v2292_v54 }
  0x4c   :  { %1817 = vmatprep.subr.bf16.mxu1 %v2099_v3 }
 0x10e   :  { %v2237_v18 = vpop.f32.mrb[0].mxu0 }
 0x10f   :  { %v165_v19 = vpop.f32.mrb[1].mxu0 }
 0x110   :  { %v166_v20 = vadd.f32 %v2235_v17, %v165_v19  ;;  %v2240_v21 = vpop.f32.mrb[2].mxu0 }
 0x111   :  { %v2242_v22 = vpop.f32.mrb[3].mxu0  ;;  %v288_v25 = vpop.f32.mrb[0].mxu1 }
 0x112   :  { %v294_v26 = vadd.f32 %v288_v25, %v166_v20  ;;  %v1763_v27 = vpop.f32.mrb[1].mxu1  ;;  %v169_v25 = vadd.f32 %v2235_v17, %v2242_v22 }
 0x113   :  { %v291_v28 = vpop.f32.mrb[2].mxu1 }
 0x114   :  { %v295_v29 = vmul.f32 %v294_v26, %v2244_v24  ;;  %v1764_v30 = vpop.f32.mrb[3].mxu1 }
 0x116   :  { %1947 = vtanh.f32 %v295_v29  ;;  %v2312_v63 = vpop.f32.mrb[4].mxu0 }
 0x117   :  { %v2314_v0 = vpop.f32.mrb[5].mxu0 }
 0x118   :  { %v2316_v1 = vpop.f32.mrb[6].mxu0 }
 0x119   :  { %v2318_v2 = vpop.f32.mrb[7].mxu0 }
 0x120   :  { %v1948_v31 = vpop.eup %1947 }
 0x121   :  { %v297_v33 = vmul.f32 %v1948_v31, %v2244_v24 }
 0x123   :  { %v298_v34 = vadd.f32 %v297_v33, %v2247_v32 }
 0x125   :  { %305 = vrot.lane.b32.xlu0 %v298_v34, %s2103_s25 }
 0x129   :  { %300 = vrot.lane.b32.xlu0 %v226_v36, %s2104_s26 }
 0x12d   :  { %233 = vperm.xlu0 %1933, %v231_v37   ;;  %v228_v37 = vld [vmem:[#allocation6] sm:$0xff] }
 0x197   :  { %v306_v38 = vpop.permute.xlu0 %305 }
 0x198   :  { %v308_v39 = vmul.f32 %v306_v38, %v298_v34 }
 0x19a   :  { %310 = vrot.lane.b32.xlu1 %v308_v39, %s2104_s26 }
 0x19b   :  { %v2261_v40 = vpop.permute.xlu0 %300 }
 0x19c   :  { %v303_v41 = vmul.f32 %v2261_v40, %v298_v34 }
 0x1ac   :  { %v2300_v57 = vpop.permute.xlu0 %233 }
 0x1ad   :  { %vm235_vm7 = vcmp.eq.s32.totalorder %v2300_v57, 1 }
 0x20c   :  { %v311_v42 = vpop.permute.xlu1 %310 }
 0x20d   :  { %v2264_v43 = vadd.f32 %v311_v42, %v303_v41 }
 0x20f   :  { %1949 = vtanh.f32 %v2264_v43 }
 0x219   :  { %v1950_v52 = vpop.eup %1949 }
 0x21a   :  { %316 = vrot.lane.b32.xlu1 %v1950_v52, %s2103_s25 }
 0x21e   :  { %322 = vrot.lane.b32.xlu1 %v2218_v12, %s2105_s27  ;;  %v2338_v12 = vld [vmem:[%s2934_s7] ss:$0 sm:$0xff] }
 0x28c   :  { %v317_v56 = vpop.permute.xlu1 %316 }
 0x28d   :  { %v319_v58 = vmul.f32 %v317_v56, %v298_v34  ;;  %v2366_v56 = vsel %vm235_vm7, %v2264_v43, %v2261_v40 }
 0x28f   :  { %v1934_v59 = vpack.i.bf16 %v2298_v55, %v319_v58 }
 0x290   :  { %v323_v60 = vpop.permute.xlu1 %322 }
 0x291   :  { %v2306_v61 = vsel %vm235_vm7, %v319_v58, %v323_v60  ;;  %1935 = vrot.lane.b32.xlu1 %v1934_v59, %s2104_s26 }
 0x292   :  { %v456_v62 = vpack.c.bf16 %v2306_v61, %v2306_v61 }
 0x294   :  { %458 = vrot.lane.b32.xlu0 %v456_v62, %s2104_s26 }
 0x303   :  { %v1936_v5 = vpop.permute.xlu1 %1935 }
 0x304   :  { %v1938_v6 = vunpack.i.h.bf16 %v1936_v5  ;;  %v1937_v7 = vunpack.i.l.bf16 %v1936_v5 }
 0x306   :  { %v334_v8 = vsel %vm62_vm0, %v1937_v7, %v1938_v6  ;;  %v459_v10 = vpop.permute.xlu0 %458 }
 0x307   :  { %v335_v9 = vpack.c.bf16 %v334_v8, %v334_v8 }
 0x309   :  { %1774 = vmatmul.mubr.msk.bf16.vlgmr.msra.gmra.mrb[8].mxu0 %vm366_vm8, %v335_v9 }
 0x30a   :  { %1778 = vmatpush3.bf16.msra.mxu0 %v2207_v4  ;;  %1781 = vmatprep.mubr.msk.bf16.mxu0 %vm2100_vm2, %v2099_v3 }
 0x30b   :  { %1779 = vmatprep.subr.bf16.mxu0 %v2099_v3 }
 0x30e   :  { %1780 = vmatpush3.bf16.msra.mxu0 %v2214_v11 }
 0x30f   :  { %1797 = vmatprep.subr.bf16.mxu0 %v2099_v3 }
 0x311   :  { %1782 = vmatmul.mubr.msk.bf16.vlgmr.msra.gmra.mrb[12].mxu0 %vm62_vm0, %v459_v10 }
 0x312   :  { %1798 = vmatpush3.bf16.msra.mxu0 %v2207_v4  ;;  %1801 = vmatprep.mubr.msk.bf16.mxu0 %vm2100_vm2, %v2099_v3 }
 0x313   :  { %1799 = vmatprep.subr.bf16.mxu0 %v2099_v3 }
 0x316   :  { %1800 = vmatpush3.bf16.msra.mxu0 %v2214_v11 }
 0x317   :  { %1805 = vmatprep.subr.bf16.mxu0 %v2099_v3 }
 0x3dc   :  { %v404_v13 = vpop.f32.mrb[8].mxu0 }
 0x3dd   :  { %v405_v15 = vadd.f32 %v2338_v12, %v404_v13  ;;  %v1775_v16 = vpop.f32.mrb[9].mxu0 }
 0x3de   :  { %v407_v19 = vpop.f32.mrb[10].mxu0 }
 0x3df   :  { %v410_v20 = vmul.f32 %v405_v15, %v2244_v24  ;;  %v1776_v23 = vpop.f32.mrb[11].mxu0 }
 0x3e1   :  { %1951 = vtanh.f32 %v410_v20 }
 0x3e4   :  { %v497_v26 = vpop.f32.mrb[12].mxu0 }
 0x3e5   :  { %v503_v27 = vadd.f32 %v497_v26, %v169_v25  ;;  %v1783_v28 = vpop.f32.mrb[13].mxu0 }
 0x3e6   :  { %v500_v29 = vpop.f32.mrb[14].mxu0 }
 0x3e7   :  { %v504_v30 = vmul.f32 %v503_v27, %v2244_v24  ;;  %v1784_v31 = vpop.f32.mrb[15].mxu0 }
 0x3e9   :  { %1953 = vtanh.f32 %v504_v30 }
 0x3eb   :  { %v1952_v33 = vpop.eup %1951 }
 0x3ec   :  { %v412_v34 = vmul.f32 %v1952_v33, %v2244_v24 }
 0x3ee   :  { %v413_v36 = vadd.f32 %v412_v34, %v2247_v32 }
 0x3f0   :  { %420 = vrot.lane.b32.xlu1 %v413_v36, %s2103_s25 }
 0x3f3   :  { %v1954_v38 = vpop.eup %1953 }
 0x3f4   :  { %415 = vrot.lane.b32.xlu1 %v228_v37, %s2104_s26  ;;  %v506_v22 = vmul.f32 %v1954_v38, %v2244_v24 }
 0x3f6   :  { %v507_v39 = vadd.f32 %v506_v22, %v2247_v32 }
 0x3f8   :  { %510 = vrot.lane.b32.xlu0 %v507_v39, %s2103_s25  ;;  %v508_v58 = vmul.f32 %v507_v39, %v2366_v56 }
 0x462   :  { %v421_v41 = vpop.permute.xlu1 %420 }
 0x463   :  { %v423_v42 = vmul.f32 %v421_v41, %v413_v36 }
 0x465   :  { %425 = vrot.lane.b32.xlu0 %v423_v42, %s2104_s26 }
 0x466   :  { %v2356_v48 = vpop.permute.xlu1 %415 }
 0x467   :  { %v418_v49 = vmul.f32 %v2356_v48, %v413_v36 }
 0x469   :  { %451 = vperm.xlu0 %1933, %v449_v45  }
 0x46a   :  { %v511_v46 = vpop.permute.xlu0 %510 }
 0x46b   :  { %v513_v47 = vmul.f32 %v511_v46, %v507_v39 }
 0x46d   :  { %515 = vrot.lane.b32.xlu1 %v513_v47, %s2104_s26 }
 0x4d7   :  { %v426_v51 = vpop.permute.xlu0 %425 }
 0x4d8   :  { %v2359_v52 = vadd.f32 %v426_v51, %v418_v49 }
 0x4da   :  { %1955 = vtanh.f32 %v2359_v52 }
 0x4df   :  { %v516_v59 = vpop.permute.xlu1 %515 }
 0x4e0   :  { %v2369_v60 = vadd.f32 %v516_v59, %v508_v58  ;;  %v613_v58 = vsel %vm1658_vm11, 1, %v2101_v14  ;;  %v2435_v59 = vsel %vm235_vm7, %v2359_v52, %v2356_v48 }
 0x4e2   :  { %1957 = vtanh.f32 %v2369_v60 }
 0x4e4   :  { %v1956_v62 = vpop.eup %1955 }
 0x4e5   :  { %431 = vrot.lane.b32.xlu1 %v1956_v62, %s2103_s25 }
 0x4e8   :  { %v2378_v40 = vpop.permute.xlu0 %451 }
 0x4e9   :  { %436 = vrot.lane.b32.xlu1 %v2298_v55, %s2105_s27  ;;  %vm453_vm10 = vcmp.eq.s32.totalorder %v2378_v40, 1 }
 0x4ec   :  { %v1958_v5 = vpop.eup %1957 }
 0x4ed   :  { %521 = vrot.lane.b32.xlu0 %v1958_v5, %s2103_s25  ;;  %v2442_v5 = vsel %vm453_vm10, %v2369_v60, %v2366_v56 }
 0x557   :  { %v432_v6 = vpop.permute.xlu1 %431 }
 0x558   :  { %v2376_v7 = vmul.f32 %v432_v6, %v413_v36 }
 0x55b   :  { %v437_v43 = vpop.permute.xlu1 %436 }
 0x55c   :  { %v2383_v8 = vsel %vm235_vm7, %v2376_v7, %v437_v43 }
 0x55d   :  { %532 = vrot.lane.b32.xlu1 %v2383_v8, %s2103_s25 }
 0x55f   :  { %v522_v9 = vpop.permute.xlu0 %521 }
 0x560   :  { %v524_v10 = vmul.f32 %v522_v9, %v507_v39 }
 0x562   :  { %528 = vrot.lane.b32.xlu0 %v524_v10, %s2104_s26  ;;  %v2392_v55 = vsel %vm453_vm10, %v524_v10, %v2306_v61  ;;  %v174_v61 = vadd.f32 %v2237_v18, %v2235_v17 }
 0x563   :  { %v620_v13 = vpack.c.bf16 %v2392_v55, %v2392_v55 }
 0x566   :  { %622 = vrot.lane.b32.xlu0 %v620_v13, %s2104_s26 }
 0x5cf   :  { %v533_v15 = vpop.permute.xlu1 %532 }
 0x5d4   :  { %v529_v16 = vpop.permute.xlu0 %528 }
 0x5d5   :  { %v535_v19 = vsel %vm62_vm0, %v529_v16, %v533_v15 }
 0x5d6   :  { %v536_v20 = vpack.c.bf16 %v535_v19, %v535_v19 }
 0x5d8   :  { %1794 = vmatmul.mubr.msk.bf16.vlgmr.msra.gmra.mrb[4].mxu1 %vm366_vm8, %v536_v20  ;;  %v623_v23 = vpop.permute.xlu0 %622 }
 0x5d9   :  { %1802 = vmatmul.mubr.msk.bf16.vlgmr.msra.gmra.mrb[16].mxu0 %vm62_vm0, %v623_v23  ;;  %1818 = vmatpush3.bf16.msra.mxu1 %v2207_v4 }
 0x5da   :  { %1806 = vmatpush3.bf16.msra.mxu0 %v2267_v44  ;;  %1819 = vmatprep.subr.bf16.mxu1 %v2099_v3 }
 0x5db   :  { %1807 = vmatprep.subr.bf16.mxu0 %v2099_v3  ;;  %1813 = vmatprep.mubr.msk.bf16.mxu0 %vm2100_vm2, %v2099_v3 }
 0x5dc   :  { %1821 = vmatprep.mubr.msk.bf16.mxu1 %vm2100_vm2, %v2099_v3 }
 0x5dd   :  { %1820 = vmatpush3.bf16.msra.mxu1 %v2214_v11 }
 0x5de   :  { %1808 = vmatpush3.bf16.msra.mxu0 %v2270_v50  ;;  %1825 = vmatprep.subr.bf16.mxu1 %v2099_v3 }
 0x5df   :  { %1809 = vmatprep.subr.bf16.mxu0 %v2099_v3 }
 0x5e2   :  { %1810 = vmatpush3.bf16.msra.mxu0 %v2281_v53 }
 0x5e3   :  { %1811 = vmatprep.subr.bf16.mxu0 %v2099_v3 }
 0x5e6   :  { %1812 = vmatpush3.bf16.msra.mxu0 %v2292_v54 }
 0x5e7   :  { %1837 = vmatprep.subr.bf16.mxu0 %v2099_v3 }
 0x6ab   :  { %v574_v25 = vpop.f32.mrb[4].mxu1 }
 0x6ac   :  { %v575_v26 = vadd.f32 %v2338_v12, %v574_v25  ;;  %v1795_v27 = vpop.f32.mrb[5].mxu1  ;;  %v661_v28 = vpop.f32.mrb[16].mxu0 }
 0x6ad   :  { %v667_v29 = vadd.f32 %v661_v28, %v174_v61  ;;  %v577_v30 = vpop.f32.mrb[6].mxu1  ;;  %v1803_v31 = vpop.f32.mrb[17].mxu0 }
 0x6ae   :  { %v580_v33 = vmul.f32 %v575_v26, %v2244_v24  ;;  %v1796_v34 = vpop.f32.mrb[7].mxu1  ;;  %v664_v36 = vpop.f32.mrb[18].mxu0 }
 0x6af   :  { %v668_v37 = vmul.f32 %v667_v29, %v2244_v24  ;;  %v1804_v38 = vpop.f32.mrb[19].mxu0 }
 0x6b0   :  { %1959 = vtanh.f32 %v580_v33 }
 0x6b1   :  { %1961 = vtanh.f32 %v668_v37 }
 0x6ba   :  { %v1960_v22 = vpop.eup %1959 }
 0x6bb   :  { %v1962_v39 = vpop.eup %1961  ;;  %v582_v18 = vmul.f32 %v1960_v22, %v2244_v24 }
 0x6bc   :  { %v670_v41 = vmul.f32 %v1962_v39, %v2244_v24 }
 0x6bd   :  { %v583_v42 = vadd.f32 %v582_v18, %v2247_v32 }
 0x6be   :  { %v671_v45 = vadd.f32 %v670_v41, %v2247_v32 }
 0x6bf   :  { %586 = vrot.lane.b32.xlu1 %v583_v42, %s2103_s25  ;;  %v584_v62 = vmul.f32 %v583_v42, %v2435_v59 }
 0x6c0   :  { %674 = vrot.lane.b32.xlu0 %v671_v45, %s2103_s25  ;;  %v672_v43 = vmul.f32 %v671_v45, %v2442_v5 }
 0x731   :  { %v587_v46 = vpop.permute.xlu1 %586 }
 0x732   :  { %v589_v47 = vmul.f32 %v587_v46, %v583_v42  ;;  %v675_v49 = vpop.permute.xlu0 %674 }
 0x733   :  { %v677_v51 = vmul.f32 %v675_v49, %v671_v45 }
 0x734   :  { %591 = vrot.lane.b32.xlu1 %v589_v47, %s2104_s26 }
 0x735   :  { %679 = vrot.lane.b32.xlu0 %v677_v51, %s2104_s26 }
 0x738   :  { %615 = vperm.xlu1 %1939, %v613_v58  }
 0x7a6   :  { %v592_v6 = vpop.permute.xlu1 %591 }
 0x7a7   :  { %v2445_v9 = vadd.f32 %v592_v6, %v584_v62  ;;  %v680_v10 = vpop.permute.xlu0 %679 }
 0x7a8   :  { %v2447_v13 = vadd.f32 %v680_v10, %v672_v43  ;;  %v777_v43 = vsel %vm1661_vm13, 1, %v2101_v14 }
 0x7a9   :  { %1963 = vtanh.f32 %v2445_v9  ;;  %v2513_v10 = vsel %vm453_vm10, %v2445_v9, %v2435_v59 }
 0x7aa   :  { %1965 = vtanh.f32 %v2447_v13 }
 0x7b3   :  { %v1964_v48 = vpop.eup %1963 }
 0x7b4   :  { %v1966_v52 = vpop.eup %1965  ;;  %597 = vrot.lane.b32.xlu0 %v1964_v48, %s2103_s25 }
 0x7b5   :  { %685 = vrot.lane.b32.xlu1 %v1966_v52, %s2103_s25 }
 0x7b7   :  { %v2453_v56 = vpop.permute.xlu1 %615 }
 0x7b8   :  { %vm617_vm12 = vcmp.eq.s32.totalorder %v2453_v56, 1 }
 0x7b9   :  { %v2520_v52 = vsel %vm617_vm12, %v2447_v13, %v2442_v5 }
 0x826   :  { %v598_v60 = vpop.permute.xlu0 %597 }
 0x827   :  { %v2455_v15 = vmul.f32 %v598_v60, %v583_v42  ;;  %v686_v16 = vpop.permute.xlu1 %685 }
 0x828   :  { %v688_v19 = vmul.f32 %v686_v16, %v671_v45 }
 0x829   :  { %v2462_v20 = vsel %vm453_vm10, %v2455_v15, %v2383_v8 }
 0x82a   :  { %696 = vrot.lane.b32.xlu1 %v2462_v20, %s2103_s25  ;;  %692 = vrot.lane.b32.xlu0 %v688_v19, %s2104_s26  ;;  %v2470_v23 = vsel %vm617_vm12, %v688_v19, %v2392_v55  ;;  %v177_v55 = vadd.f32 %v2240_v21, %v2235_v17 }
 0x82b   :  { %v784_v61 = vpack.c.bf16 %v2470_v23, %v2470_v23 }
 0x82e   :  { %786 = vrot.lane.b32.xlu0 %v784_v61, %s2104_s26 }
 0x89c   :  { %v693_v25 = vpop.permute.xlu0 %692  ;;  %v697_v26 = vpop.permute.xlu1 %696 }
 0x89d   :  { %v699_v8 = vsel %vm62_vm0, %v693_v25, %v697_v26 }
 0x89e   :  { %v700_v27 = vpack.c.bf16 %v699_v8, %v699_v8 }
 0x8a0   :  { %v787_v28 = vpop.permute.xlu0 %786  ;;  %1814 = vmatmul.mubr.msk.bf16.vlgmr.msra.gmra.mrb[20].mxu0 %vm366_vm8, %v700_v27 }
 0x8a1   :  { %1822 = vmatmul.mubr.msk.bf16.vlgmr.msra.gmra.mrb[8].mxu1 %vm62_vm0, %v787_v28  ;;  %1838 = vmatpush3.bf16.msra.mxu0 %v2207_v4 }
 0x8a2   :  { %1826 = vmatpush3.bf16.msra.mxu1 %v2267_v44  ;;  %1839 = vmatprep.subr.bf16.mxu0 %v2099_v3 }
 0x8a3   :  { %1827 = vmatprep.subr.bf16.mxu1 %v2099_v3  ;;  %1833 = vmatprep.mubr.msk.bf16.mxu1 %vm2100_vm2, %v2099_v3 }
 0x8a4   :  { %1841 = vmatprep.mubr.msk.bf16.mxu0 %vm2100_vm2, %v2099_v3 }
 0x8a5   :  { %1840 = vmatpush3.bf16.msra.mxu0 %v2214_v11 }
 0x8a6   :  { %1828 = vmatpush3.bf16.msra.mxu1 %v2270_v50  ;;  %1845 = vmatprep.subr.bf16.mxu0 %v2099_v3 }
 0x8a7   :  { %1829 = vmatprep.subr.bf16.mxu1 %v2099_v3 }
 0x8aa   :  { %1830 = vmatpush3.bf16.msra.mxu1 %v2281_v53 }
 0x8ab   :  { %1831 = vmatprep.subr.bf16.mxu1 %v2099_v3 }
 0x8ae   :  { %1832 = vmatpush3.bf16.msra.mxu1 %v2292_v54 }
 0x8af   :  { %1857 = vmatprep.subr.bf16.mxu1 %v2099_v3 }
 0x973   :  { %v738_v29 = vpop.f32.mrb[20].mxu0 }
 0x974   :  { %v739_v30 = vadd.f32 %v2338_v12, %v738_v29  ;;  %v1815_v31 = vpop.f32.mrb[21].mxu0  ;;  %v825_v33 = vpop.f32.mrb[8].mxu1 }
 0x975   :  { %v831_v34 = vadd.f32 %v825_v33, %v177_v55  ;;  %v741_v36 = vpop.f32.mrb[22].mxu0  ;;  %v1823_v37 = vpop.f32.mrb[9].mxu1 }
 0x976   :  { %v744_v38 = vmul.f32 %v739_v30, %v2244_v24  ;;  %v1816_v22 = vpop.f32.mrb[23].mxu0  ;;  %v828_v39 = vpop.f32.mrb[10].mxu1 }
 0x977   :  { %v832_v18 = vmul.f32 %v831_v34, %v2244_v24  ;;  %v1824_v41 = vpop.f32.mrb[11].mxu1 }
 0x978   :  { %1967 = vtanh.f32 %v744_v38 }
 0x979   :  { %1969 = vtanh.f32 %v832_v18 }
 0x982   :  { %v1968_v42 = vpop.eup %1967 }
 0x983   :  { %v1970_v45 = vpop.eup %1969  ;;  %v746_v21 = vmul.f32 %v1968_v42, %v2244_v24 }
 0x984   :  { %v834_v46 = vmul.f32 %v1970_v45, %v2244_v24 }
 0x985   :  { %v747_v47 = vadd.f32 %v746_v21, %v2247_v32 }
 0x986   :  { %v835_v49 = vadd.f32 %v834_v46, %v2247_v32 }
 0x987   :  { %750 = vrot.lane.b32.xlu1 %v747_v47, %s2103_s25  ;;  %v748_v48 = vmul.f32 %v747_v47, %v2513_v10 }
 0x988   :  { %838 = vrot.lane.b32.xlu0 %v835_v49, %s2103_s25  ;;  %v836_v16 = vmul.f32 %v835_v49, %v2520_v52 }
 0x9f9   :  { %v751_v51 = vpop.permute.xlu1 %750 }
 0x9fa   :  { %v753_v58 = vmul.f32 %v751_v51, %v747_v47  ;;  %v839_v62 = vpop.permute.xlu0 %838 }
 0x9fb   :  { %v841_v6 = vmul.f32 %v839_v62, %v835_v49 }
 0x9fc   :  { %755 = vrot.lane.b32.xlu1 %v753_v58, %s2104_s26 }
 0x9fd   :  { %843 = vrot.lane.b32.xlu0 %v841_v6, %s2104_s26 }
 0xa00   :  { %779 = vperm.xlu1 %1939, %v777_v43  }
 0xa6e   :  { %v756_v60 = vpop.permute.xlu1 %755 }
 0xa6f   :  { %v2523_v19 = vadd.f32 %v756_v60, %v748_v48  ;;  %v844_v61 = vpop.permute.xlu0 %843 }
 0xa70   :  { %v2525_v25 = vadd.f32 %v844_v61, %v836_v16  ;;  %v941_v61 = vsel %vm1664_vm15, 1, %v2101_v14 }
 0xa71   :  { %1971 = vtanh.f32 %v2523_v19 }
 0xa72   :  { %1973 = vtanh.f32 %v2525_v25 }
 0xa7b   :  { %v1972_v59 = vpop.eup %1971 }
 0xa7c   :  { %v1974_v9 = vpop.eup %1973  ;;  %761 = vrot.lane.b32.xlu0 %v1972_v59, %s2103_s25  ;;  %v2591_v59 = vsel %vm617_vm12, %v2523_v19, %v2513_v10 }
 0xa7d   :  { %849 = vrot.lane.b32.xlu1 %v1974_v9, %s2103_s25 }
 0xa7f   :  { %v2531_v5 = vpop.permute.xlu1 %779 }
 0xa80   :  { %vm781_vm14 = vcmp.eq.s32.totalorder %v2531_v5, 1 }
 0xaee   :  { %v762_v13 = vpop.permute.xlu0 %761 }
 0xaef   :  { %v2533_v26 = vmul.f32 %v762_v13, %v747_v47  ;;  %v850_v8 = vpop.permute.xlu1 %849  ;;  %v2598_v13 = vsel %vm781_vm14, %v2525_v25, %v2520_v52 }
 0xaf0   :  { %v852_v27 = vmul.f32 %v850_v8, %v835_v49 }
 0xaf1   :  { %v2540_v28 = vsel %vm617_vm12, %v2533_v26, %v2462_v20 }
 0xaf2   :  { %856 = vrot.lane.b32.xlu0 %v852_v27, %s2104_s26  ;;  %860 = vrot.lane.b32.xlu1 %v2540_v28, %s2103_s25  ;;  %v2548_v55 = vsel %vm781_vm14, %v852_v27, %v2470_v23  ;;  %v182_v23 = vadd.f32 %v2235_v17, %v2314_v0 }
 0xaf3   :  { %v948_v29 = vpack.c.bf16 %v2548_v55, %v2548_v55 }
 0xaf6   :  { %950 = vrot.lane.b32.xlu0 %v948_v29, %s2104_s26 }
 0xb64   :  { %v861_v30 = vpop.permute.xlu1 %860  ;;  %v857_v31 = vpop.permute.xlu0 %856 }
 0xb65   :  { %v863_v20 = vsel %vm62_vm0, %v857_v31, %v861_v30 }
 0xb66   :  { %v864_v33 = vpack.c.bf16 %v863_v20, %v863_v20 }
 0xb68   :  { %1834 = vmatmul.mubr.msk.bf16.vlgmr.msra.gmra.mrb[12].mxu1 %vm366_vm8, %v864_v33  ;;  %v951_v34 = vpop.permute.xlu0 %950 }
 0xb69   :  { %1842 = vmatmul.mubr.msk.bf16.vlgmr.msra.gmra.mrb[24].mxu0 %vm62_vm0, %v951_v34  ;;  %1858 = vmatpush3.bf16.msra.mxu1 %v2207_v4 }
 0xb6a   :  { %1846 = vmatpush3.bf16.msra.mxu0 %v2267_v44  ;;  %1859 = vmatprep.subr.bf16.mxu1 %v2099_v3 }
 0xb6b   :  { %1847 = vmatprep.subr.bf16.mxu0 %v2099_v3  ;;  %1853 = vmatprep.mubr.msk.bf16.mxu0 %vm2100_vm2, %v2099_v3 }
 0xb6c   :  { %1861 = vmatprep.mubr.msk.bf16.mxu1 %vm2100_vm2, %v2099_v3 }
 0xb6d   :  { %1860 = vmatpush3.bf16.msra.mxu1 %v2214_v11 }
 0xb6e   :  { %1848 = vmatpush3.bf16.msra.mxu0 %v2270_v50  ;;  %1865 = vmatprep.subr.bf16.mxu1 %v2099_v3 }
 0xb6f   :  { %1849 = vmatprep.subr.bf16.mxu0 %v2099_v3 }
 0xb72   :  { %1850 = vmatpush3.bf16.msra.mxu0 %v2281_v53 }
 0xb73   :  { %1851 = vmatprep.subr.bf16.mxu0 %v2099_v3 }
 0xb76   :  { %1852 = vmatpush3.bf16.msra.mxu0 %v2292_v54 }
 0xb77   :  { %1877 = vmatprep.subr.bf16.mxu0 %v2099_v3 }
 0xc3b   :  { %v902_v36 = vpop.f32.mrb[12].mxu1 }
 0xc3c   :  { %v903_v37 = vadd.f32 %v2338_v12, %v902_v36  ;;  %v1835_v38 = vpop.f32.mrb[13].mxu1  ;;  %v989_v22 = vpop.f32.mrb[24].mxu0 }
 0xc3d   :  { %v995_v39 = vadd.f32 %v989_v22, %v182_v23  ;;  %v905_v18 = vpop.f32.mrb[14].mxu1  ;;  %v1843_v41 = vpop.f32.mrb[25].mxu0 }
 0xc3e   :  { %v908_v42 = vmul.f32 %v903_v37, %v2244_v24  ;;  %v1836_v45 = vpop.f32.mrb[15].mxu1  ;;  %v992_v21 = vpop.f32.mrb[26].mxu0 }
 0xc3f   :  { %v996_v46 = vmul.f32 %v995_v39, %v2244_v24  ;;  %v1844_v47 = vpop.f32.mrb[27].mxu0 }
 0xc40   :  { %1975 = vtanh.f32 %v908_v42 }
 0xc41   :  { %1977 = vtanh.f32 %v996_v46 }
 0xc4a   :  { %v1976_v49 = vpop.eup %1975 }
 0xc4b   :  { %v1978_v51 = vpop.eup %1977  ;;  %v910_v0 = vmul.f32 %v1976_v49, %v2244_v24 }
 0xc4c   :  { %v998_v58 = vmul.f32 %v1978_v51, %v2244_v24 }
 0xc4d   :  { %v911_v62 = vadd.f32 %v910_v0, %v2247_v32 }
 0xc4e   :  { %v999_v6 = vadd.f32 %v998_v58, %v2247_v32 }
 0xc4f   :  { %914 = vrot.lane.b32.xlu1 %v911_v62, %s2103_s25  ;;  %v912_v9 = vmul.f32 %v911_v62, %v2591_v59 }
 0xc50   :  { %1002 = vrot.lane.b32.xlu0 %v999_v6, %s2103_s25  ;;  %v1000_v27 = vmul.f32 %v999_v6, %v2598_v13 }
 0xcc1   :  { %v915_v43 = vpop.permute.xlu1 %914 }
 0xcc2   :  { %v917_v48 = vmul.f32 %v915_v43, %v911_v62  ;;  %v1003_v60 = vpop.permute.xlu0 %1002 }
 0xcc3   :  { %v1005_v16 = vmul.f32 %v1003_v60, %v999_v6 }
 0xcc4   :  { %919 = vrot.lane.b32.xlu1 %v917_v48, %s2104_s26 }
 0xcc5   :  { %1007 = vrot.lane.b32.xlu0 %v1005_v16, %s2104_s26 }
 0xcc8   :  { %943 = vperm.xlu1 %1939, %v941_v61  }
 0xd36   :  { %v920_v8 = vpop.permute.xlu1 %919 }
 0xd37   :  { %v2601_v29 = vadd.f32 %v920_v8, %v912_v9  ;;  %v1008_v30 = vpop.permute.xlu0 %1007 }
 0xd38   :  { %v2603_v31 = vadd.f32 %v1008_v30, %v1000_v27  ;;  %v1105_v27 = vsel %vm1667_vm3, 1, %v2101_v14 }
 0xd39   :  { %1979 = vtanh.f32 %v2601_v29  ;;  %v2669_v30 = vsel %vm781_vm14, %v2601_v29, %v2591_v59 }
 0xd3a   :  { %1981 = vtanh.f32 %v2603_v31 }
 0xd43   :  { %v1980_v10 = vpop.eup %1979 }
 0xd44   :  { %v1982_v19 = vpop.eup %1981  ;;  %925 = vrot.lane.b32.xlu0 %v1980_v10, %s2103_s25 }
 0xd45   :  { %1013 = vrot.lane.b32.xlu1 %v1982_v19, %s2103_s25 }
 0xd47   :  { %v2609_v52 = vpop.permute.xlu1 %943 }
 0xd48   :  { %vm945_vm1 = vcmp.eq.s32.totalorder %v2609_v52, 1 }
 0xd49   :  { %v2676_v19 = vsel %vm945_vm1, %v2603_v31, %v2598_v13 }
 0xdb6   :  { %v926_v25 = vpop.permute.xlu0 %925 }
 0xdb7   :  { %v2611_v20 = vmul.f32 %v926_v25, %v911_v62  ;;  %v1014_v33 = vpop.permute.xlu1 %1013 }
 0xdb8   :  { %v1016_v34 = vmul.f32 %v1014_v33, %v999_v6 }
 0xdb9   :  { %v2618_v23 = vsel %vm781_vm14, %v2611_v20, %v2540_v28 }
 0xdba   :  { %1024 = vrot.lane.b32.xlu1 %v2618_v23, %s2103_s25  ;;  %1020 = vrot.lane.b32.xlu0 %v1016_v34, %s2104_s26  ;;  %v2626_v36 = vsel %vm945_vm1, %v1016_v34, %v2548_v55 }
 0xdbb   :  { %v1112_v37 = vpack.c.bf16 %v2626_v36, %v2626_v36 }
 0xdbe   :  { %1114 = vrot.lane.b32.xlu0 %v1112_v37, %s2104_s26 }
 0xe2c   :  { %v1021_v38 = vpop.permute.xlu0 %1020  ;;  %v1025_v22 = vpop.permute.xlu1 %1024 }
 0xe2d   :  { %v1027_v28 = vsel %vm62_vm0, %v1021_v38, %v1025_v22 }
 0xe2e   :  { %v1028_v39 = vpack.c.bf16 %v1027_v28, %v1027_v28 }
 0xe30   :  { %v1115_v18 = vpop.permute.xlu0 %1114  ;;  %1854 = vmatmul.mubr.msk.bf16.vlgmr.msra.gmra.mrb[28].mxu0 %vm366_vm8, %v1028_v39 }
 0xe31   :  { %1862 = vmatmul.mubr.msk.bf16.vlgmr.msra.gmra.mrb[16].mxu1 %vm62_vm0, %v1115_v18  ;;  %1878 = vmatpush3.bf16.msra.mxu0 %v2207_v4  ;;  %v185_v4 = vadd.f32 %v2235_v17, %v2318_v2 }
 0xe32   :  { %1866 = vmatpush3.bf16.msra.mxu1 %v2267_v44  ;;  %1879 = vmatprep.subr.bf16.mxu0 %v2099_v3 }
 0xe33   :  { %1867 = vmatprep.subr.bf16.mxu1 %v2099_v3  ;;  %1873 = vmatprep.mubr.msk.bf16.mxu1 %vm2100_vm2, %v2099_v3 }
 0xe34   :  { %1881 = vmatprep.mubr.msk.bf16.mxu0 %vm2100_vm2, %v2099_v3 }
 0xe35   :  { %1880 = vmatpush3.bf16.msra.mxu0 %v2214_v11 }
 0xe36   :  { %1868 = vmatpush3.bf16.msra.mxu1 %v2270_v50  ;;  %1885 = vmatprep.subr.bf16.mxu0 %v2099_v3 }
 0xe37   :  { %1869 = vmatprep.subr.bf16.mxu1 %v2099_v3 }
 0xe3a   :  { %1870 = vmatpush3.bf16.msra.mxu1 %v2281_v53 }
 0xe3b   :  { %1871 = vmatprep.subr.bf16.mxu1 %v2099_v3 }
 0xe3e   :  { %1872 = vmatpush3.bf16.msra.mxu1 %v2292_v54 }
 0xe3f   :  { %1897 = vmatprep.subr.bf16.mxu1 %v2099_v3 }
 0xf03   :  { %v1066_v55 = vpop.f32.mrb[28].mxu0 }
 0xf04   :  { %v1067_v11 = vadd.f32 %v2338_v12, %v1066_v55  ;;  %v1855_v41 = vpop.f32.mrb[29].mxu0  ;;  %v1153_v42 = vpop.f32.mrb[16].mxu1 }
 0xf05   :  { %v1159_v45 = vadd.f32 %v1153_v42, %v185_v4  ;;  %v1069_v21 = vpop.f32.mrb[30].mxu0  ;;  %v1863_v46 = vpop.f32.mrb[17].mxu1 }
 0xf06   :  { %v1072_v47 = vmul.f32 %v1067_v11, %v2244_v24  ;;  %v1856_v49 = vpop.f32.mrb[31].mxu0  ;;  %v1156_v51 = vpop.f32.mrb[18].mxu1  ;;  %v2012_v21 = vld [vmem:[%s2931_s4 + $0x8] sm:$0xff]  }
 0xf07   :  { %v1160_v0 = vmul.f32 %v1159_v45, %v2244_v24  ;;  %v1864_v58 = vpop.f32.mrb[19].mxu1 }
 0xf08   :  { %1983 = vtanh.f32 %v1072_v47 }
 0xf09   :  { %1985 = vtanh.f32 %v1160_v0 }
 0xf12   :  { %v1984_v62 = vpop.eup %1983 }
 0xf13   :  { %v1986_v6 = vpop.eup %1985  ;;  %v1074_v2 = vmul.f32 %v1984_v62, %v2244_v24 }
 0xf14   :  { %v1162_v43 = vmul.f32 %v1986_v6, %v2244_v24 }
 0xf15   :  { %v1075_v48 = vadd.f32 %v1074_v2, %v2247_v32 }
 0xf16   :  { %v1163_v60 = vadd.f32 %v1162_v43, %v2247_v32 }
 0xf17   :  { %1078 = vrot.lane.b32.xlu1 %v1075_v48, %s2103_s25  ;;  %v1076_v10 = vmul.f32 %v1075_v48, %v2669_v30 }
 0xf18   :  { %1166 = vrot.lane.b32.xlu0 %v1163_v60, %s2103_s25  ;;  %v1164_v33 = vmul.f32 %v1163_v60, %v2676_v19 }
 0xf89   :  { %v1079_v16 = vpop.permute.xlu1 %1078 }
 0xf8a   :  { %v1081_v61 = vmul.f32 %v1079_v16, %v1075_v48  ;;  %v1167_v9 = vpop.permute.xlu0 %1166 }
 0xf8b   :  { %v1169_v8 = vmul.f32 %v1167_v9, %v1163_v60 }
 0xf8c   :  { %1083 = vrot.lane.b32.xlu1 %v1081_v61, %s2104_s26 }
 0xf8d   :  { %1171 = vrot.lane.b32.xlu0 %v1169_v8, %s2104_s26 }
 0xf90   :  { %1107 = vperm.xlu1 %1939, %v1105_v27  }
 0xffe   :  { %v1084_v25 = vpop.permute.xlu1 %1083 }
 0xfff   :  { %v2679_v34 = vadd.f32 %v1084_v25, %v1076_v10  ;;  %v1172_v37 = vpop.permute.xlu0 %1171  ;;  %v1269_v25 = vsel %vm1670_vm5, 1, %v2101_v14 }
0x1000   :  { %v2681_v38 = vadd.f32 %v1172_v37, %v1164_v33 }
0x1001   :  { %1987 = vtanh.f32 %v2679_v34  ;;  %v2750_v33 = vsel %vm945_vm1, %v2679_v34, %v2669_v30 }
0x1002   :  { %1989 = vtanh.f32 %v2681_v38 }
0x100b   :  { %v1988_v59 = vpop.eup %1987 }
0x100c   :  { %v1990_v29 = vpop.eup %1989  ;;  %1089 = vrot.lane.b32.xlu0 %v1988_v59, %s2103_s25 }
0x100d   :  { %1177 = vrot.lane.b32.xlu1 %v1990_v29, %s2103_s25 }
0x100f   :  { %v2687_v13 = vpop.permute.xlu1 %1107 }
0x1010   :  { %vm1109_vm4 = vcmp.eq.s32.totalorder %v2687_v13, 1 }
0x1011   :  { %v2757_v35 = vsel %vm1109_vm4, %v2681_v38, %v2676_v19 }
0x107e   :  { %v1090_v31 = vpop.permute.xlu0 %1089 }
0x107f   :  { %v2689_v22 = vmul.f32 %v1090_v31, %v1075_v48  ;;  %v1178_v28 = vpop.permute.xlu1 %1177 }
0x1080   :  { %v1180_v39 = vmul.f32 %v1178_v28, %v1163_v60 }
0x1081   :  { %v2696_v18 = vsel %vm945_vm1, %v2689_v22, %v2618_v23 }
0x1082   :  { %1184 = vrot.lane.b32.xlu0 %v1180_v39, %s2104_s26  ;;  %1188 = vrot.lane.b32.xlu1 %v2696_v18, %s2103_s25  ;;  %v2704_v4 = vsel %vm1109_vm4, %v1180_v39, %v2626_v36  ;;  %v2011_v36 = vld [vmem:[%s2931_s4] sm:$0xff]  }
0x1083   :  { %v1276_v55 = vpack.c.bf16 %v2704_v4, %v2704_v4 }
0x1086   :  { %1278 = vrot.lane.b32.xlu0 %v1276_v55, %s2104_s26 }
0x10f4   :  { %v1189_v11 = vpop.permute.xlu1 %1188  ;;  %v1185_v41 = vpop.permute.xlu0 %1184 }
0x10f5   :  { %v1191_v23 = vsel %vm62_vm0, %v1185_v41, %v1189_v11 }
0x10f6   :  { %v1192_v42 = vpack.c.bf16 %v1191_v23, %v1191_v23 }
0x10f8   :  { %1874 = vmatmul.mubr.msk.bf16.vlgmr.msra.gmra.mrb[20].mxu1 %vm366_vm8, %v1192_v42  ;;  %v1279_v45 = vpop.permute.xlu0 %1278 }
0x10f9   :  { %1882 = vmatmul.mubr.msk.bf16.vlgmr.msra.gmra.mrb[32].mxu0 %vm62_vm0, %v1279_v45  ;;  %1898 = vmatpush3.bf16.msra.mxu1 %v2011_v36 }
0x10fa   :  { %1886 = vmatpush3.bf16.msra.mxu0 %v2267_v44  ;;  %1899 = vmatprep.subr.bf16.mxu1 %v2099_v3  ;;  %v190_v44 = vadd.f32 %v2312_v63, %v2235_v17 }
0x10fb   :  { %1887 = vmatprep.subr.bf16.mxu0 %v2099_v3  ;;  %1893 = vmatprep.mubr.msk.bf16.mxu0 %vm2100_vm2, %v2099_v3 }
0x10fc   :  { %1901 = vmatprep.mubr.msk.bf16.mxu1 %vm2100_vm2, %v2099_v3 }
0x10fd   :  { %1900 = vmatpush3.bf16.msra.mxu1 %v2012_v21 }
0x10fe   :  { %1888 = vmatpush3.bf16.msra.mxu0 %v2270_v50  ;;  %1905 = vmatprep.subr.bf16.mxu1 %v2099_v3 }
0x10ff   :  { %1889 = vmatprep.subr.bf16.mxu0 %v2099_v3 }
0x1102   :  { %1890 = vmatpush3.bf16.msra.mxu0 %v2281_v53 }
0x1103   :  { %1891 = vmatprep.subr.bf16.mxu0 %v2099_v3 }
0x1106   :  { %1892 = vmatpush3.bf16.msra.mxu0 %v2292_v54 }
0x11cb   :  { %v1230_v46 = vpop.f32.mrb[20].mxu1 }
0x11cc   :  { %v1231_v47 = vadd.f32 %v2338_v12, %v1230_v46  ;;  %v1875_v49 = vpop.f32.mrb[21].mxu1  ;;  %v1317_v51 = vpop.f32.mrb[32].mxu0 }
0x11cd   :  { %v1323_v0 = vadd.f32 %v1317_v51, %v190_v44  ;;  %v1233_v50 = vpop.f32.mrb[22].mxu1  ;;  %v1883_v58 = vpop.f32.mrb[33].mxu0  ;;  %v2015_v49 = vld [vmem:[#allocation12 + $0x10] sm:$0xff]   ;;  %v2016_v51 = vld [vmem:[%s2932_s5] ss:$0 sm:$0xff] }
0x11ce   :  { %v1236_v62 = vmul.f32 %v1231_v47, %v2244_v24  ;;  %v1876_v6 = vpop.f32.mrb[23].mxu1  ;;  %v1320_v2 = vpop.f32.mrb[34].mxu0  ;;  %v2013_v47 = vld [vmem:[#allocation12] sm:$0xff]  }
0x11cf   :  { %v1324_v53 = vmul.f32 %v1323_v0, %v2244_v24  ;;  %v1884_v43 = vpop.f32.mrb[35].mxu0  ;;  %v193_v0 = vadd.f32 %v2016_v51, %v2316_v1 }
0x11d0   :  { %1991 = vtanh.f32 %v1236_v62 }
0x11d1   :  { %1993 = vtanh.f32 %v1324_v53 }
0x11da   :  { %v1992_v48 = vpop.eup %1991 }
0x11db   :  { %v1994_v60 = vpop.eup %1993  ;;  %v1238_v17 = vmul.f32 %v1992_v48, %v2244_v24 }
0x11dc   :  { %v1326_v63 = vmul.f32 %v1994_v60, %v2244_v24 }
0x11dd   :  { %v1239_v16 = vadd.f32 %v1238_v17, %v2247_v32 }
0x11de   :  { %v1327_v61 = vadd.f32 %v1326_v63, %v2247_v32 }
0x11df   :  { %1242 = vrot.lane.b32.xlu1 %v1239_v16, %s2103_s25  ;;  %v1240_v37 = vmul.f32 %v1239_v16, %v2750_v33 }
0x11e0   :  { %1330 = vrot.lane.b32.xlu0 %v1327_v61, %s2103_s25  ;;  %v1328_v29 = vmul.f32 %v1327_v61, %v2757_v35 }
0x1251   :  { %v1243_v9 = vpop.permute.xlu1 %1242 }
0x1252   :  { %v1245_v8 = vmul.f32 %v1243_v9, %v1239_v16  ;;  %v1331_v27 = vpop.permute.xlu0 %1330 }
0x1253   :  { %v1333_v10 = vmul.f32 %v1331_v27, %v1327_v61 }
0x1254   :  { %1247 = vrot.lane.b32.xlu1 %v1245_v8, %s2104_s26 }
0x1255   :  { %1335 = vrot.lane.b32.xlu0 %v1333_v10, %s2104_s26 }
0x1258   :  { %1271 = vperm.xlu1 %1939, %v1269_v25  }
0x12c6   :  { %v1248_v59 = vpop.permute.xlu1 %1247 }
0x12c7   :  { %v2760_v31 = vadd.f32 %v1248_v59, %v1240_v37  ;;  %v1336_v28 = vpop.permute.xlu0 %1335 }
0x12c8   :  { %v2762_v39 = vadd.f32 %v1336_v28, %v1328_v29 }
0x12c9   :  { %1995 = vtanh.f32 %v2760_v31  ;;  %v2818_v37 = vsel %vm1109_vm4, %v2760_v31, %v2750_v33 }
0x12ca   :  { %1997 = vtanh.f32 %v2762_v39 }
0x12d3   :  { %v1996_v30 = vpop.eup %1995 }
0x12d4   :  { %v1998_v34 = vpop.eup %1997  ;;  %1253 = vrot.lane.b32.xlu0 %v1996_v30, %s2103_s25 }
0x12d5   :  { %1341 = vrot.lane.b32.xlu1 %v1998_v34, %s2103_s25 }
0x12d7   :  { %v2768_v19 = vpop.permute.xlu1 %1271 }
0x12d8   :  { %vm1273_vm6 = vcmp.eq.s32.totalorder %v2768_v19, 1  ;;  %v931_v19 = vsel %vm781_vm14, %v2611_v20, 0.0 }
0x12d9   :  { %v2825_v29 = vsel %vm1273_vm6, %v2762_v39, %v2757_v35 }
0x1346   :  { %v1254_v38 = vpop.permute.xlu0 %1253 }
0x1347   :  { %v2770_v55 = vmul.f32 %v1254_v38, %v1239_v16  ;;  %v1342_v11 = vpop.permute.xlu1 %1341 }
0x1348   :  { %v1344_v41 = vmul.f32 %v1342_v11, %v1327_v61 }
0x1349   :  { %v2777_v23 = vsel %vm1109_vm4, %v2770_v55, %v2696_v18 }
0x134a   :  { %1352 = vrot.lane.b32.xlu1 %v2777_v23, %s2103_s25  ;;  %1348 = vrot.lane.b32.xlu0 %v1344_v41, %s2104_s26  ;;  %v2785_v42 = vsel %vm1273_vm6, %v1344_v41, %v2704_v4  ;;  %v2014_v4 = vld [vmem:[#allocation12 + $0x8] sm:$0xff]  }
0x134b   :  { %v1440_v45 = vpack.c.bf16 %v2785_v42, %v2785_v42 }
0x134e   :  { %1442 = vrot.lane.b32.xlu0 %v1440_v45, %s2104_s26 }
0x13bc   :  { %v1349_v36 = vpop.permute.xlu0 %1348  ;;  %v1353_v21 = vpop.permute.xlu1 %1352 }
0x13bd   :  { %v1355_v18 = vsel %vm62_vm0, %v1349_v36, %v1353_v21 }
0x13be   :  { %v1356_v44 = vpack.c.bf16 %v1355_v18, %v1355_v18 }
0x13c0   :  { %v1443_v46 = vpop.permute.xlu0 %1442  ;;  %1894 = vmatmul.mubr.msk.bf16.vlgmr.msra.gmra.mrb[36].mxu0 %vm366_vm8, %v1356_v44 }
0x13c1   :  { %1902 = vmatmul.mubr.msk.bf16.vlgmr.msra.gmra.mrb[24].mxu1 %vm62_vm0, %v1443_v46 }
0x13c2   :  { %1906 = vmatpush3.bf16.msra.mxu1 %v2013_v47  ;;  %1913 = vmatprep.mubr.msk.bf16.mxu1 %vm2100_vm2, %v2099_v3 }
0x13c3   :  { %1907 = vmatprep.subr.bf16.mxu1 %v2099_v3 }
0x13c6   :  { %1908 = vmatpush3.bf16.msra.mxu1 %v2014_v4  ;;  %v2017_v4 = vld [vmem:[%s2934_s7] ss:$0 sm:$0xff] }
0x13c7   :  { %1909 = vmatprep.subr.bf16.mxu1 %v2099_v3 }
0x13ca   :  { %1910 = vmatpush3.bf16.msra.mxu1 %v2015_v49 }
0x13cb   :  { %1911 = vmatprep.subr.bf16.mxu1 %v2099_v3 }
0x13ce   :  { %1912 = vmatpush3.bf16.msra.mxu1 %v2292_v54 }
0x1493   :  { %v1394_v50 = vpop.f32.mrb[36].mxu0 }
0x1494   :  { %v1395_v58 = vadd.f32 %v2338_v12, %v1394_v50  ;;  %v1895_v62 = vpop.f32.mrb[37].mxu0  ;;  %v1481_v6 = vpop.f32.mrb[24].mxu1 }
0x1495   :  { %v1487_v2 = vadd.f32 %v1481_v6, %v193_v0  ;;  %v1397_v53 = vpop.f32.mrb[38].mxu0  ;;  %v1903_v43 = vpop.f32.mrb[25].mxu1 }
0x1496   :  { %v1400_v48 = vmul.f32 %v1395_v58, %v2244_v24  ;;  %v1896_v60 = vpop.f32.mrb[39].mxu0  ;;  %v1484_v3 = vpop.f32.mrb[26].mxu1  ;;  %v440_v43 = vsel %vm235_vm7, %v2376_v7, 0.0 }
0x1497   :  { %v1488_v54 = vmul.f32 %v1487_v2, %v2244_v24  ;;  %v1904_v17 = vpop.f32.mrb[27].mxu1  ;;  %v2018_v2 = vld [vmem:[%s2928_s1] sm:$0xff] }
0x1498   :  { %1999 = vtanh.f32 %v1400_v48  ;;  %vm1673_vm2 = vcmp.gt.s32.totalorder %v2018_v2, 7 }
0x1499   :  { %2001 = vtanh.f32 %v1488_v54  ;;  %v1433_v53 = vsel %vm1673_vm2, 1, %v2101_v14 }
0x14a2   :  { %v2000_v63 = vpop.eup %1999 }
0x14a3   :  { %v2002_v16 = vpop.eup %2001  ;;  %v1402_v1 = vmul.f32 %v2000_v63, %v2244_v24 }
0x14a4   :  { %v1490_v12 = vmul.f32 %v2002_v16, %v2244_v24 }
0x14a5   :  { %v1403_v61 = vadd.f32 %v1402_v1, %v2247_v32  ;;  %v603_v1 = vsel %vm453_vm10, %v2455_v15, 0.0 }
0x14a6   :  { %v1491_v9 = vadd.f32 %v1490_v12, %v2247_v32  ;;  %v1259_v12 = vsel %vm1109_vm4, %v2770_v55, 0.0 }
0x14a7   :  { %1406 = vrot.lane.b32.xlu1 %v1403_v61, %s2103_s25  ;;  %v1404_v59 = vmul.f32 %v1403_v61, %v2818_v37 }
0x14a8   :  { %1494 = vrot.lane.b32.xlu0 %v1491_v9, %s2103_s25  ;;  %v1492_v30 = vmul.f32 %v1491_v9, %v2825_v29 }
0x1519   :  { %v1407_v8 = vpop.permute.xlu1 %1406 }
0x151a   :  { %v1409_v27 = vmul.f32 %v1407_v8, %v1403_v61  ;;  %v1495_v10 = vpop.permute.xlu0 %1494 }
0x151b   :  { %v1497_v25 = vmul.f32 %v1495_v10, %v1491_v9 }
0x151c   :  { %1411 = vrot.lane.b32.xlu1 %v1409_v27, %s2104_s26 }
0x151d   :  { %1499 = vrot.lane.b32.xlu0 %v1497_v25, %s2104_s26 }
0x158e   :  { %v1412_v28 = vpop.permute.xlu1 %1411 }
0x158f   :  { %v1414_v34 = vadd.f32 %v1412_v28, %v1404_v59  ;;  %v1500_v38 = vpop.permute.xlu0 %1499 }
0x1590   :  { %v2828_v11 = vadd.f32 %v1500_v38, %v1492_v30 }
0x1591   :  { %2003 = vtanh.f32 %v1414_v34  ;;  %v1421_v3 = vsel %vm1273_vm6, %v1414_v34, %v2818_v37 }
0x1592   :  { %2005 = vtanh.f32 %v2828_v11 }
0x159b   :  { %v2004_v33 = vpop.eup %2003 }
0x159c   :  { %v2006_v31 = vpop.eup %2005  ;;  %1417 = vrot.lane.b32.xlu1 %v2004_v33, %s2103_s25 }
0x159d   :  { %1505 = vrot.lane.b32.xlu0 %v2006_v31, %s2103_s25 }
0x160e   :  { %v1418_v41 = vpop.permute.xlu1 %1417 }
0x160f   :  { %v1420_v45 = vmul.f32 %v1418_v41, %v1403_v61  ;;  %v1506_v35 = vpop.permute.xlu0 %1505 }
0x1610   :  { %v1508_v39 = vmul.f32 %v1506_v35, %v1491_v9 }
0x1611   :  { %v2836_v36 = vsel %vm1273_vm6, %v1420_v45, %v2777_v23  ;;  %v1423_v14 = vsel %vm1273_vm6, %v1420_v45, 0.0 }
0x1612   :  { %1512 = vrot.lane.b32.xlu1 %v1508_v39, %s2104_s26  ;;  %1516 = vrot.lane.b32.xlu0 %v2836_v36, %s2103_s25 }
0x1684   :  { %v1517_v21 = vpop.permute.xlu0 %1516  ;;  %v1513_v18 = vpop.permute.xlu1 %1512 }
0x1685   :  { %v1519_v44 = vsel %vm62_vm0, %v1513_v18, %v1517_v21 }
0x1686   :  { %v1520_v46 = vpack.c.bf16 %v1519_v44, %v1519_v44 }
0x1688   :  { %1914 = vmatmul.mubr.msk.bf16.vlgmr.msra.gmra.mrb[28].mxu1 %vm366_vm8, %v1520_v46 }
0x175b   :  { %v1558_v47 = vpop.f32.mrb[28].mxu1 }
0x175c   :  { %v1559_v49 = vadd.f32 %v2017_v4, %v1558_v47  ;;  %v1915_v23 = vpop.f32.mrb[29].mxu1 }
0x175d   :  { %v1561_v51 = vpop.f32.mrb[30].mxu1 }
0x175e   :  { %v1564_v0 = vmul.f32 %v1559_v49, %v2244_v24  ;;  %v1916_v50 = vpop.f32.mrb[31].mxu1 }
0x1760   :  { %2007 = vtanh.f32 %v1564_v0 }
0x176a   :  { %v2008_v58 = vpop.eup %2007 }
0x176b   :  { %v1566_v62 = vmul.f32 %v2008_v58, %v2244_v24  ;;  %v767_v24 = vsel %vm617_vm12, %v2533_v26, 0.0 }
0x176d   :  { %v1567_v6 = vadd.f32 %v1566_v62, %v2247_v32  ;;  %v1095_v32 = vsel %vm945_vm1, %v2689_v22, 0.0 }
0x176f   :  { %1570 = vrot.lane.b32.xlu1 %v1567_v6, %s2103_s25  ;;  %v1568_v54 = vmul.f32 %v1567_v6, %v1421_v3 }
0x1773   :  { %1435 = vperm.xlu1 %1939, %v1433_v53  }
0x1777   :  { %442 = vrot.lane.b32.xlu1 %v440_v43, %s2104_s26 }
0x177b   :  { %769 = vrot.lane.b32.xlu1 %v767_v24, %s2104_s26 }
0x177f   :  { %1097 = vrot.lane.b32.xlu1 %v1095_v32, %s2104_s26 }
0x1783   :  { %1425 = vrot.lane.b32.xlu1 %v1423_v14, %s2104_s26 }
0x17e1   :  { %v1571_v57 = vpop.permute.xlu1 %1570 }
0x17e2   :  { %v1573_v7 = vmul.f32 %v1571_v57, %v1567_v6 }
0x17e4   :  { %1575 = vrot.lane.b32.xlu0 %v1573_v7, %s2104_s26 }
0x17f2   :  { %v1436_v48 = vpop.permute.xlu1 %1435 }
0x17f3   :  { %vm1437_vm7 = vcmp.eq.s32.totalorder %v1436_v48, 1 }
0x17f4   :  { %v1510_v56 = vsel %vm1437_vm7, %v1508_v39, %v2785_v42  ;;  %v1509_v40 = vsel %vm1437_vm7, %v2828_v11, %v2825_v29 }
0x17f5   :  { %1595 = vrot.lane.b32.xlu1 %v1510_v56, %s2104_s26 }
0x17f6   :  { %v443_v26 = vpop.permute.xlu1 %442 }
0x17f7   :  { %445 = vst.msk [vmem:[#allocation14] sm:$0xff] %vm62_vm0, %v443_v26 }
0x17fa   :  { %v770_v52 = vpop.permute.xlu1 %769 }
0x17fb   :  { %773 = vst.msk [vmem:[#allocation14 + $0x10] sm:$0xff] %vm62_vm0, %v770_v52 }
0x17fe   :  { %v1098_v22 = vpop.permute.xlu1 %1097 }
0x17ff   :  { %1101 = vst.msk [vmem:[#allocation14 + $0x20] sm:$0xff] %vm62_vm0, %v1098_v22 }
0x1802   :  { %v1426_v60 = vpop.permute.xlu1 %1425 }
0x1803   :  { %1429 = vst.msk [vmem:[#allocation14 + $0x30] sm:$0xff] %vm62_vm0, %v1426_v60 }
0x1856   :  { %v1576_v42 = vpop.permute.xlu0 %1575 }
0x1857   :  { %v1578_v17 = vadd.f32 %v1576_v42, %v1568_v54 }
0x1859   :  { %2009 = vtanh.f32 %v1578_v17  ;;  %v1585_v13 = vsel %vm1437_vm7, %v1578_v17, %v1421_v3 }
0x1863   :  { %v2010_v63 = vpop.eup %2009 }
0x1864   :  { %1581 = vrot.lane.b32.xlu0 %v2010_v63, %s2103_s25 }
0x1867   :  { %v1596_v16 = vpop.permute.xlu1 %1595 }
0x1868   :  { %1598 = vst.msk [vmem:[#allocation3] sm:$0xff] %vm62_vm0, %v1596_v16  ;;  %605 = vrot.lane.b32.xlu0 %v603_v1, %s2104_s26 }
0x186c   :  { %933 = vrot.lane.b32.xlu0 %v931_v19, %s2104_s26 }
0x1870   :  { %1261 = vrot.lane.b32.xlu0 %v1259_v12, %s2104_s26 }
0x1874   :  { %1600 = vrot.lane.b32.xlu0 %v1509_v40, %s2105_s27 }
0x18d6   :  { %v1582_v15 = vpop.permute.xlu0 %1581 }
0x18d7   :  { %v1584_v61 = vmul.f32 %v1582_v15, %v1567_v6 }
0x18d9   :  { %v1587_v9 = vsel %vm1437_vm7, %v1584_v61, 0.0  ;;  %v1586_v5 = vsel %vm1437_vm7, %v1584_v61, %v2836_v36 }
0x18da   :  { %1589 = vrot.lane.b32.xlu0 %v1587_v9, %s2104_s26  ;;  %1605 = vrot.lane.b32.xlu1 %v1586_v5, %s2104_s26  ;;  %v606_v20 = vpop.permute.xlu0 %605 }
0x18db   :  { %609 = vst.msk [vmem:[#allocation14 + $0x8] sm:$0xff] %vm62_vm0, %v606_v20 }
0x18de   :  { %1610 = vrot.lane.b32.xlu0 %v1585_v13, %s2105_s27  ;;  %v934_v55 = vpop.permute.xlu0 %933 }
0x18df   :  { %937 = vst.msk [vmem:[#allocation14 + $0x18] sm:$0xff] %vm62_vm0, %v934_v55 }
0x18e2   :  { %v1262_v8 = vpop.permute.xlu0 %1261 }
0x18e3   :  { %1265 = vst.msk [vmem:[#allocation14 + $0x28] sm:$0xff] %vm62_vm0, %v1262_v8 }
0x18e6   :  { %v1601_v27 = vpop.permute.xlu0 %1600 }
0x18e7   :  { %1603 = vst.msk [vmem:[#allocation4] sm:$0xff] %vm62_vm0, %v1601_v27 }
0x194c   :  { %v1606_v10 = vpop.permute.xlu1 %1605  ;;  %v1590_v25 = vpop.permute.xlu0 %1589 }
0x194d   :  { %1608 = vst.msk [vmem:[#allocation5] sm:$0xff] %vm62_vm0, %v1606_v10  ;;  %1593 = vst.msk [vmem:[#allocation14 + $0x38] sm:$0xff] %vm62_vm0, %v1590_v25 }
0x1950   :  { %v1611_v37 = vpop.permute.xlu0 %1610 }
0x1951   :  { %1613 = vst.msk [vmem:[#allocation6] sm:$0xff] %vm62_vm0, %v1611_v37 }
0x1952 PF:  { %s2106_s1 = smov [#allocation14]  }
0x1953   :  { %s1619_s7 = sshll.u32 %s2106_s1, 4  ;;  %s1620_s7 = int_to_ptr.vmem [resolvable:$true] %s1619_s7 }
0x1954   :  { %s2063_s14 = scalar_lea.vmem %s1620_s7, 1024  ;;  %p2068_p7 = scmp.lt.s32.totalorder %s1620_s7, %s1620_s7 }
0x1955   :  { %p2064_p6 = scmp.ne.s32.totalorder %s1620_s7, %s2063_s14  ;;  %p2069_p8 = scmp.lt.s32.totalorder %s2063_s14, %s2063_s14 }
0x1957   :  { %p2070_p9 = por %p2069_p8, %p2068_p7 }
0x1959   :  { %p2071_p10 = pnand %p2070_p9, %p2064_p6 }
0x195b   :  { %2074 = shalt.err (!%p2071_p10)
}
0x195c   :  { %s2075_s19 = scalar_lea.hbm %s2935_s8, 1024 }
0x195d   :  { %p2076_p11 = scmp.ne.s32.totalorder %s2935_s8, %s2075_s19  ;;  %p2079_p12 = scmp.lt.u32.totalorder %s2075_s19, %s2935_s8 }
0x195f   :  { %p2081_p13 = pnand %p2079_p12, %p2076_p11 }
0x1961   :  { %2084 = shalt.err (!%p2081_p13)
}
0x1962   :  { %1625 = dma.vmem_to_hbm [thread:$0]  %s1620_s7, 1024, %s2935_s8, [#allocation11], %s2092_s15, %s2092_s15, %s2093_s16  }
0x1963   :  { %2089 = dma.done.wait [#allocation11], 1024  }
0x1964   :  { %2090 = vsyncadd [#allocation11], 4294966272 }
0x1965   :  { %1629 = vsyncpa [#allocation10], 1 }
0x1966   :  { %1630 = vsyncpa [#allocation13], 1 }
0x1967   :  { %1631 = vsyncpa [#allocation11], 1 }

</bundles_post_ra>
